<compile_context>
chip_gen: v7x
topology: tpu7x:2x2x1
jax: 0.10.0
libtpu: 0.0.40
codegen_flags: <defaults>
</compile_context>

<pallas_src>
import jax
import jax.numpy as jnp
from jax import lax
from jax.experimental import pallas as pl
from jax.experimental.pallas import tpu as pltpu


# ----------------------------------------------------------------------------
# Kernel
# ----------------------------------------------------------------------------
def _bottleneck_kernel(x_ref, xt_ref, xb_ref, w1_ref, b1_ref, w2_ref, b2_ref,
                       w3_ref, b3_ref, o_ref):
    i = pl.program_id(1)                 # H-tile index
    nt = pl.num_programs(1)
    tile_h, W, Cin = x_ref.shape
    Cmid = w1_ref.shape[1]
    Cout = w3_ref.shape[1]
    mm = w1_ref.dtype                    # bf16 or f32 matmul operands
    f32 = jnp.float32

    # ---- conv1 (1x1) + folded-BN1 bias + ReLU on the main tile rows ----
    x2d = x_ref[...].reshape(tile_h * W, Cin).astype(mm)
    t_main = jnp.maximum(
        jnp.dot(x2d, w1_ref[...], preferred_element_type=f32) + b1_ref[...], 0.0)
    t_main = t_main.reshape(tile_h, W, Cmid).astype(mm)

    # ---- conv1 on the two H-halo rows (rows i*tile_h-1 and (i+1)*tile_h) ----
    # The index_map clamped out-of-image rows to valid rows; gate them to zero
    # so conv2 sees zero padding of the *post-bn1-relu* activation (not bn1 of
    # zero-padded x).
    xh = jnp.concatenate([xt_ref[...], xb_ref[...]], axis=0).astype(mm)  # (2W, Cin)
    t_halo = jnp.maximum(
        jnp.dot(xh, w1_ref[...], preferred_element_type=f32) + b1_ref[...], 0.0)
    t_halo = t_halo.reshape(2, W, Cmid).astype(mm)
    top_gate = jnp.where(i > 0, 1.0, 0.0).astype(mm)        # scalar gates
    bot_gate = jnp.where(i < nt - 1, 1.0, 0.0).astype(mm)
    t_top = t_halo[0:1] * top_gate
    t_bot = t_halo[1:2] * bot_gate

    # (tile_h + 2, W, Cmid) conv1 activation including the H halo.
    t1 = jnp.concatenate([t_top, t_main, t_bot], axis=0)

    # dx = -1 / +1 taps: shift along W with an explicit zero edge column (W is
    # never padded, so every streamed block stays aligned).
    zcol = jnp.zeros((tile_h + 2, 1, Cmid), mm)
    t_l = jnp.concatenate([zcol, t1[:, :W - 1, :]], axis=1)   # tap kx = 0
    t_r = jnp.concatenate([t1[:, 1:, :], zcol], axis=1)       # tap kx = 2
    ws = jnp.concatenate([t_l, t1, t_r], axis=-1)             # (tile_h+2, W, 3*Cmid)

    # ---- conv2 (3x3, stride 1, dil 1): 3 MXU matmuls (one per dy), K = 3*Cmid.
    # Accumulator is initialized by the dy=0 matmul (no zeros + add).
    def dy_mat(dy):
        a = ws[dy:dy + tile_h].reshape(tile_h * W, 3 * Cmid)
        return jnp.dot(a, w2_ref[dy], preferred_element_type=f32)

    acc = dy_mat(0)
    acc = acc + dy_mat(1)
    acc = acc + dy_mat(2)
    t2 = jnp.maximum(acc + b2_ref[...], 0.0).astype(mm)

    # ---- conv3 (1x1) + folded-BN3 bias ----
    t3 = jnp.dot(t2, w3_ref[...], preferred_element_type=f32) + b3_ref[...]

    # ---- identity residual + final ReLU (aligned re-read of the main block) --
    res = x_ref[...].reshape(tile_h * W, Cout).astype(f32)
    out = jnp.maximum(t3 + res, 0.0)
    o_ref[...] = out.reshape(tile_h, W, Cout).astype(o_ref.dtype)


# ----------------------------------------------------------------------------
# Wrapper (NHWC native; NCHW adapter for module parity)
# ----------------------------------------------------------------------------
def _vmem_budget_bytes():
    """Generation-aware scoped-VMEM budget."""
    cap = 0
    try:
        info = pltpu.get_tpu_info()
        cap = int(getattr(info, "vmem_capacity_bytes", 0) or 0)
    except Exception:
        cap = 0
    if cap <= 0:
        return 44 * 2**20            # unknown part -> conservative (safe on v7x)
    if cap <= 80 * 2**20:
        return 48 * 2**20            # v7x-class: 64 MiB physical per TensorCore
    return 100 * 2**20               # v5e / v6e: 128 MiB physical


def _pick_tile_h(N, H, W, Cin, Cmid, Cout, stream_dtype, mm_dtype, budget):
    s_it = jnp.dtype(stream_dtype).itemsize
    m_it = jnp.dtype(mm_dtype).itemsize

    def est(th):                     # conservative per-step VMEM footprint
        rp, main = th + 2, th * W
        return (2 * main * Cin * s_it + 4 * W * Cin * s_it          # x + halo blocks
                + 2 * main * Cout * s_it                            # out blocks
                + 2 * (Cin * Cmid + 9 * Cmid * Cmid + Cmid * Cout) * m_it
                + main * Cmid * 4                                   # t_main f32
                + 4 * rp * W * Cmid * m_it                          # t1 / t_l / t_r
                + rp * W * 3 * Cmid * m_it                          # ws
                + main * Cmid * (4 + 4 + m_it)                      # acc / t2
                + main * Cout * (4 + 4 + s_it))                     # t3 / out

    divs = [d for d in range(1, H + 1) if H % d == 0]
    fit = [d for d in divs if est(d) <= 0.7 * budget] or [min(divs)]
    multi = [d for d in fit if N * (H // d) >= 2]    # keep >= 2 grid steps (v7x: 2 TCs)
    return max(multi if multi else fit)


def bottleneck_pallas_nhwc(x, params, *, tile_h=None, mm_bf16=True):
    """x: (N, H, W, Cin) f32 or bf16. Returns (N, H, W, Cout) in x.dtype."""
    (w1, s1, b1, w2, s2, b2, w3, s3, b3) = params
    N, H, W, Cin = x.shape
    Cmid = w1.shape[1]
    Cout = w3.shape[1]
    assert Cin == Cout, "identity residual requires inplanes == planes * expansion"

    stream_dtype = x.dtype
    mm_dtype = jnp.bfloat16 if (mm_bf16 or stream_dtype == jnp.bfloat16) else jnp.float32

    budget = _vmem_budget_bytes()
    if tile_h is None:
        tile_h = _pick_tile_h(N, H, W, Cin, Cmid, Cout, stream_dtype, mm_dtype, budget)
    assert H % tile_h == 0, "tile_h must divide H"
    nt = H // tile_h

    # Fold eval-mode BN scales into the conv output channels (host-side).
    w1f = (w1 * s1.reshape(1, Cmid)).astype(mm_dtype)
    w2f = (w2 * s2.reshape(1, 1, 1, Cmid)).reshape(3, 3 * Cmid, Cmid).astype(mm_dtype)
    w3f = (w3 * s3.reshape(1, Cout)).astype(mm_dtype)
    b1f = b1.reshape(1, Cmid).astype(jnp.float32)
    b2f = b2.reshape(1, Cmid).astype(jnp.float32)
    b3f = b3.reshape(1, Cout).astype(jnp.float32)

    def resident(shape):
        return pl.BlockSpec(shape, lambda n, i: (0,) * len(shape))

    x_main_spec = pl.BlockSpec((None, tile_h, W, Cin), lambda n, i: (n, i, 0, 0))
    x_top_spec = pl.BlockSpec(
        (None, None, W, Cin),
        lambda n, i: (n, jnp.maximum(i * tile_h - 1, 0), 0, 0))
    x_bot_spec = pl.BlockSpec(
        (None, None, W, Cin),
        lambda n, i: (n, jnp.minimum((i + 1) * tile_h, H - 1), 0, 0))

    out = pl.pallas_call(
        _bottleneck_kernel,
        out_shape=jax.ShapeDtypeStruct((N, H, W, Cout), stream_dtype),
        grid=(N, nt),
        in_specs=[
            x_main_spec,                       # main (tile_h, W, Cin) tile
            x_top_spec,                        # halo row above the tile
            x_bot_spec,                        # halo row below the tile
            resident((Cin, Cmid)),             # w1 (BN1 folded)
            resident((1, Cmid)),               # b1
            resident((3, 3 * Cmid, Cmid)),     # w2, kx/cin stacked along K (BN2 folded)
            resident((1, Cmid)),               # b2
            resident((Cmid, Cout)),            # w3 (BN3 folded)
            resident((1, Cout)),               # b3
        ],
        out_specs=pl.BlockSpec((None, tile_h, W, Cout), lambda n, i: (n, i, 0, 0)),
        compiler_params=pltpu.CompilerParams(
            dimension_semantics=("parallel", "parallel"),
            vmem_limit_bytes=int(budget)),
    )(x, x, x, w1f, b1f, w2f, b2f, w3f, b3f)
    return out


def bottleneck_pallas_nchw(x_nchw, params, **kw):
    # TODO(synk): hoist the NCHW<->NHWC conversion to the model edges; chained
    # bottleneck blocks should call bottleneck_pallas_nhwc directly so these two
    # full-HBM-pass transposes disappear.
    x = jnp.transpose(x_nchw, (0, 2, 3, 1))
    out = bottleneck_pallas_nhwc(x, params, **kw)
    return jnp.transpose(out, (0, 3, 1, 2))


# ----------------------------------------------------------------------------
# Pure-JAX reference and synthetic params
# ----------------------------------------------------------------------------
def bottleneck_reference_nhwc(x, params):
    (w1, s1, b1, w2, s2, b2, w3, s3, b3) = params
    dn = ("NHWC", "HWIO", "NHWC")

    def conv(inp, w, pad):
        return lax.conv_general_dilated(inp, w, window_strides=(1, 1),
                                        padding=pad, dimension_numbers=dn)

    t = conv(x, w1.reshape(1, 1, *w1.shape), "VALID")
    t = jnp.maximum(t * s1.reshape(-1) + b1.reshape(-1), 0.0)
    t = conv(t, w2, [(1, 1), (1, 1)])
    t = jnp.maximum(t * s2.reshape(-1) + b2.reshape(-1), 0.0)
    t = conv(t, w3.reshape(1, 1, *w3.shape), "VALID")
    t = t * s3.reshape(-1) + b3.reshape(-1)
    return jnp.maximum(t + x, 0.0)


def make_params(key, inplanes, planes, expansion=4, eps=1e-5):
    cout = planes * expansion
    keys = jax.random.split(key, 12)

    def bn_fold(kg, kb, km, kv, c):
        gamma = 1.0 + 0.1 * jax.random.normal(kg, (c,), jnp.float32)
        beta = 0.1 * jax.random.normal(kb, (c,), jnp.float32)
        mean = 0.1 * jax.random.normal(km, (c,), jnp.float32)
        var = jnp.abs(jax.random.normal(kv, (c,), jnp.float32)) + 0.5
        scale = gamma / jnp.sqrt(var + eps)
        bias = beta - mean * scale
        return scale.reshape(1, c), bias.reshape(1, c)

    w1 = 0.1 * jax.random.normal(keys[0], (inplanes, planes), jnp.float32)
    w2 = 0.1 * jax.random.normal(keys[1], (3, 3, planes, planes), jnp.float32)
    w3 = 0.1 * jax.random.normal(keys[2], (planes, cout), jnp.float32)
    s1, b1 = bn_fold(keys[3], keys[4], keys[5], keys[6], planes)
    s2, b2 = bn_fold(keys[7], keys[8], keys[9], keys[10], planes)
    s3, b3 = bn_fold(keys[11], keys[3], keys[7], keys[0], cout)
    return (w1, s1, b1, w2, s2, b2, w3, s3, b3)


if __name__ == "__main__":
    key = jax.random.PRNGKey(0)
    k_x, k_p = jax.random.split(key)

    # NOTE: toy smoke-test shapes; real ResNet channel counts (256/64/256) fill
    # the 128-lane vregs / MXU properly, these do not.
    N, inplanes, H, W = 2, 16, 16, 16
    planes = 4   # inplanes == planes * expansion -> downsample=None identity path

    x_nchw = jax.random.normal(k_x, (N, inplanes, H, W), jnp.float32)
    params = make_params(k_p, inplanes, planes)

    x_nhwc = jnp.transpose(x_nchw, (0, 2, 3, 1))
    ref = jax.block_until_ready(bottleneck_reference_nhwc(x_nhwc, params))

    # Strict check: f32 streaming + f32 matmul operands, explicit 2-tile split
    # (exercises halo fetch + boundary gating at both edges and the interior).
    out_f32 = jax.block_until_ready(
        bottleneck_pallas_nhwc(x_nhwc, params, tile_h=8, mm_bf16=False))
    err = float(jnp.max(jnp.abs(out_f32 - ref)))
    assert out_f32.shape == ref.shape and err < 1e-4, err

    # Auto tile selection (generation-aware VMEM budget), still exact.
    out_auto = jax.block_until_ready(
        bottleneck_pallas_nhwc(x_nhwc, params, mm_bf16=False))
    err = float(jnp.max(jnp.abs(out_auto - ref)))
    assert err < 1e-4, err

    # Fast path: bf16-streamed activations + bf16 MXU operands (f32 accumulation);
    # loose tolerance — the f32 path above is the correctness gate.
    out_bf16 = jax.block_until_ready(
        bottleneck_pallas_nhwc(x_nhwc.astype(jnp.bfloat16), params, tile_h=8))
    err = float(jnp.max(jnp.abs(out_bf16.astype(jnp.float32) - ref)))
    assert err < 1e-1, err

    # NCHW drop-in adapter matching the PyTorch module interface.
    out_nchw = jax.block_until_ready(
        bottleneck_pallas_nchw(x_nchw, params, tile_h=8, mm_bf16=False))
    assert out_nchw.shape == (N, planes * 4, H, W)
    err = float(jnp.max(jnp.abs(jnp.transpose(out_nchw, (0, 2, 3, 1)) - ref)))
    assert err < 1e-4, err

    print("KERNEL_OK")
</pallas_src>

<mosaic_0001>
module attributes {stable_mosaic.version = 11 : i64} {
  func.func @_bottleneck_kernel(%arg0: i32, %arg1: i32, %arg2: memref<1x8x16x16xf32, #tpu.memory_space<vmem>>, %arg3: memref<1x1x16x16xf32, #tpu.memory_space<vmem>>, %arg4: memref<1x1x16x16xf32, #tpu.memory_space<vmem>>, %arg5: memref<16x4xf32, #tpu.memory_space<vmem>>, %arg6: memref<1x4xf32, #tpu.memory_space<vmem>>, %arg7: memref<3x12x4xf32, #tpu.memory_space<vmem>>, %arg8: memref<1x4xf32, #tpu.memory_space<vmem>>, %arg9: memref<4x16xf32, #tpu.memory_space<vmem>>, %arg10: memref<1x16xf32, #tpu.memory_space<vmem>>, %arg11: memref<1x8x16x16xf32, #tpu.memory_space<vmem>>) attributes {dimension_semantics = [#tpu.dimension_semantics<parallel>, #tpu.dimension_semantics<parallel>], iteration_bounds = array<i64: 2, 2>, scalar_prefetch = 0 : i64, scratch_operands = 0 : i64, tpu.core_type = #tpu.core_type<tc>, window_params = [{transform_indices = @transform_0, window_bounds = array<i64: 1, 8, 16, 16>}, {transform_indices = @transform_1, window_bounds = array<i64: 1, 1, 16, 16>}, {transform_indices = @transform_2, window_bounds = array<i64: 1, 1, 16, 16>}, {pipeline_mode = #tpu.pipeline_mode<synchronous>, transform_indices = @transform_3, window_bounds = array<i64: 16, 4>}, {pipeline_mode = #tpu.pipeline_mode<synchronous>, transform_indices = @transform_4, window_bounds = array<i64: 1, 4>}, {pipeline_mode = #tpu.pipeline_mode<synchronous>, transform_indices = @transform_5, window_bounds = array<i64: 3, 12, 4>}, {pipeline_mode = #tpu.pipeline_mode<synchronous>, transform_indices = @transform_6, window_bounds = array<i64: 1, 4>}, {pipeline_mode = #tpu.pipeline_mode<synchronous>, transform_indices = @transform_7, window_bounds = array<i64: 4, 16>}, {pipeline_mode = #tpu.pipeline_mode<synchronous>, transform_indices = @transform_8, window_bounds = array<i64: 1, 16>}, {transform_indices = @transform_9, window_bounds = array<i64: 1, 8, 16, 16>}]} {
    %c0 = arith.constant 0 : index
    %c0_0 = arith.constant 0 : index
    %c0_1 = arith.constant 0 : index
    %c0_2 = arith.constant 0 : index
    %0 = vector.load %arg2[%c0, %c0_0, %c0_1, %c0_2] : memref<1x8x16x16xf32, #tpu.memory_space<vmem>>, vector<1x8x16x16xf32>
    %1 = vector.shape_cast %0 : vector<1x8x16x16xf32> to vector<8x16x16xf32>
    %2 = vector.shape_cast %1 : vector<8x16x16xf32> to vector<128x16xf32>
    %c0_3 = arith.constant 0 : index
    %c0_4 = arith.constant 0 : index
    %3 = vector.load %arg5[%c0_3, %c0_4] : memref<16x4xf32, #tpu.memory_space<vmem>>, vector<16x4xf32>
    %cst = arith.constant dense<0.000000e+00> : vector<128x4xf32>
    %4 = tpu.matmul %2, %3, %cst {dimension_numbers = #tpu.dot_dimension_numbers<[1], [0], [0], [1], [0, 0, 1, 1], [], []>} : vector<128x16xf32>, vector<16x4xf32>, vector<128x4xf32> -> vector<128x4xf32>
    %c0_5 = arith.constant 0 : index
    %c0_6 = arith.constant 0 : index
    %5 = vector.load %arg6[%c0_5, %c0_6] : memref<1x4xf32, #tpu.memory_space<vmem>>, vector<1x4xf32>
    %6 = vector.broadcast %5 : vector<1x4xf32> to vector<128x4xf32>
    %7 = arith.addf %4, %6 : vector<128x4xf32>
    %cst_7 = arith.constant 0.000000e+00 : f32
    %8 = vector.broadcast %cst_7 : f32 to vector<128x4xf32>
    %9 = arith.maximumf %7, %8 : vector<128x4xf32>
    %10 = vector.shape_cast %9 : vector<128x4xf32> to vector<8x16x4xf32>
    %c0_8 = arith.constant 0 : index
    %c0_9 = arith.constant 0 : index
    %c0_10 = arith.constant 0 : index
    %c0_11 = arith.constant 0 : index
    %11 = vector.load %arg3[%c0_8, %c0_9, %c0_10, %c0_11] : memref<1x1x16x16xf32, #tpu.memory_space<vmem>>, vector<1x1x16x16xf32>
    %12 = vector.shape_cast %11 : vector<1x1x16x16xf32> to vector<16x16xf32>
    %c0_12 = arith.constant 0 : index
    %c0_13 = arith.constant 0 : index
    %c0_14 = arith.constant 0 : index
    %c0_15 = arith.constant 0 : index
    %13 = vector.load %arg4[%c0_12, %c0_13, %c0_14, %c0_15] : memref<1x1x16x16xf32, #tpu.memory_space<vmem>>, vector<1x1x16x16xf32>
    %14 = vector.shape_cast %13 : vector<1x1x16x16xf32> to vector<16x16xf32>
    %15 = tpu.concatenate %12, %14 in 0 : vector<16x16xf32>, vector<16x16xf32> -> vector<32x16xf32>
    %c0_16 = arith.constant 0 : index
    %c0_17 = arith.constant 0 : index
    %16 = vector.load %arg5[%c0_16, %c0_17] : memref<16x4xf32, #tpu.memory_space<vmem>>, vector<16x4xf32>
    %cst_18 = arith.constant dense<0.000000e+00> : vector<32x4xf32>
    %17 = tpu.matmul %15, %16, %cst_18 {dimension_numbers = #tpu.dot_dimension_numbers<[1], [0], [0], [1], [0, 0, 1, 1], [], []>} : vector<32x16xf32>, vector<16x4xf32>, vector<32x4xf32> -> vector<32x4xf32>
    %c0_19 = arith.constant 0 : index
    %c0_20 = arith.constant 0 : index
    %18 = vector.load %arg6[%c0_19, %c0_20] : memref<1x4xf32, #tpu.memory_space<vmem>>, vector<1x4xf32>
    %19 = vector.broadcast %18 : vector<1x4xf32> to vector<32x4xf32>
    %20 = arith.addf %17, %19 : vector<32x4xf32>
    %cst_21 = arith.constant 0.000000e+00 : f32
    %21 = vector.broadcast %cst_21 : f32 to vector<32x4xf32>
    %22 = arith.maximumf %20, %21 : vector<32x4xf32>
    %23 = vector.shape_cast %22 : vector<32x4xf32> to vector<2x16x4xf32>
    %c0_i32 = arith.constant 0 : i32
    %24 = arith.cmpi sgt, %arg1, %c0_i32 : i32
    %cst_22 = arith.constant 1.000000e+00 : f32
    %cst_23 = arith.constant 0.000000e+00 : f32
    %25 = arith.select %24, %cst_22, %cst_23 : f32
    %c1_i32 = arith.constant 1 : i32
    %26 = arith.cmpi slt, %arg1, %c1_i32 : i32
    %cst_24 = arith.constant 1.000000e+00 : f32
    %cst_25 = arith.constant 0.000000e+00 : f32
    %27 = arith.select %26, %cst_24, %cst_25 : f32
    %28 = vector.extract_strided_slice %23 {offsets = [0, 0, 0], sizes = [1, 16, 4], strides = [1, 1, 1]} : vector<2x16x4xf32> to vector<1x16x4xf32>
    %29 = vector.broadcast %25 : f32 to vector<1x16x4xf32>
    %30 = arith.mulf %28, %29 : vector<1x16x4xf32>
    %31 = vector.extract_strided_slice %23 {offsets = [1, 0, 0], sizes = [1, 16, 4], strides = [1, 1, 1]} : vector<2x16x4xf32> to vector<1x16x4xf32>
    %32 = vector.broadcast %27 : f32 to vector<1x16x4xf32>
    %33 = arith.mulf %31, %32 : vector<1x16x4xf32>
    %34 = tpu.concatenate %30, %10, %33 in 0 : vector<1x16x4xf32>, vector<8x16x4xf32>, vector<1x16x4xf32> -> vector<10x16x4xf32>
    %cst_26 = arith.constant 0.000000e+00 : f32
    %35 = vector.broadcast %cst_26 : f32 to vector<10x1x4xf32>
    %36 = vector.extract_strided_slice %34 {offsets = [0, 0, 0], sizes = [10, 15, 4], strides = [1, 1, 1]} : vector<10x16x4xf32> to vector<10x15x4xf32>
    %37 = tpu.concatenate %35, %36 in 1 : vector<10x1x4xf32>, vector<10x15x4xf32> -> vector<10x16x4xf32>
    %38 = vector.extract_strided_slice %34 {offsets = [0, 1, 0], sizes = [10, 15, 4], strides = [1, 1, 1]} : vector<10x16x4xf32> to vector<10x15x4xf32>
    %39 = tpu.concatenate %38, %35 in 1 : vector<10x15x4xf32>, vector<10x1x4xf32> -> vector<10x16x4xf32>
    %40 = tpu.concatenate %37, %34, %39 in 2 : vector<10x16x4xf32>, vector<10x16x4xf32>, vector<10x16x4xf32> -> vector<10x16x12xf32>
    %41 = vector.extract_strided_slice %40 {offsets = [0, 0, 0], sizes = [8, 16, 12], strides = [1, 1, 1]} : vector<10x16x12xf32> to vector<8x16x12xf32>
    %42 = vector.shape_cast %41 : vector<8x16x12xf32> to vector<128x12xf32>
    %c0_27 = arith.constant 0 : index
    %c0_28 = arith.constant 0 : index
    %c0_29 = arith.constant 0 : index
    %43 = vector.load %arg7[%c0_27, %c0_28, %c0_29] : memref<3x12x4xf32, #tpu.memory_space<vmem>>, vector<1x12x4xf32>
    %44 = vector.shape_cast %43 : vector<1x12x4xf32> to vector<12x4xf32>
    %cst_30 = arith.constant dense<0.000000e+00> : vector<128x4xf32>
    %45 = tpu.matmul %42, %44, %cst_30 {dimension_numbers = #tpu.dot_dimension_numbers<[1], [0], [0], [1], [0, 0, 1, 1], [], []>} : vector<128x12xf32>, vector<12x4xf32>, vector<128x4xf32> -> vector<128x4xf32>
    %46 = vector.extract_strided_slice %40 {offsets = [1, 0, 0], sizes = [8, 16, 12], strides = [1, 1, 1]} : vector<10x16x12xf32> to vector<8x16x12xf32>
    %47 = vector.shape_cast %46 : vector<8x16x12xf32> to vector<128x12xf32>
    %c1 = arith.constant 1 : index
    %c0_31 = arith.constant 0 : index
    %c0_32 = arith.constant 0 : index
    %48 = vector.load %arg7[%c1, %c0_31, %c0_32] : memref<3x12x4xf32, #tpu.memory_space<vmem>>, vector<1x12x4xf32>
    %49 = vector.shape_cast %48 : vector<1x12x4xf32> to vector<12x4xf32>
    %cst_33 = arith.constant dense<0.000000e+00> : vector<128x4xf32>
    %50 = tpu.matmul %47, %49, %cst_33 {dimension_numbers = #tpu.dot_dimension_numbers<[1], [0], [0], [1], [0, 0, 1, 1], [], []>} : vector<128x12xf32>, vector<12x4xf32>, vector<128x4xf32> -> vector<128x4xf32>
    %51 = arith.addf %45, %50 : vector<128x4xf32>
    %52 = vector.extract_strided_slice %40 {offsets = [2, 0, 0], sizes = [8, 16, 12], strides = [1, 1, 1]} : vector<10x16x12xf32> to vector<8x16x12xf32>
    %53 = vector.shape_cast %52 : vector<8x16x12xf32> to vector<128x12xf32>
    %c2 = arith.constant 2 : index
    %c0_34 = arith.constant 0 : index
    %c0_35 = arith.constant 0 : index
    %54 = vector.load %arg7[%c2, %c0_34, %c0_35] : memref<3x12x4xf32, #tpu.memory_space<vmem>>, vector<1x12x4xf32>
    %55 = vector.shape_cast %54 : vector<1x12x4xf32> to vector<12x4xf32>
    %cst_36 = arith.constant dense<0.000000e+00> : vector<128x4xf32>
    %56 = tpu.matmul %53, %55, %cst_36 {dimension_numbers = #tpu.dot_dimension_numbers<[1], [0], [0], [1], [0, 0, 1, 1], [], []>} : vector<128x12xf32>, vector<12x4xf32>, vector<128x4xf32> -> vector<128x4xf32>
    %57 = arith.addf %51, %56 : vector<128x4xf32>
    %c0_37 = arith.constant 0 : index
    %c0_38 = arith.constant 0 : index
    %58 = vector.load %arg8[%c0_37, %c0_38] : memref<1x4xf32, #tpu.memory_space<vmem>>, vector<1x4xf32>
    %59 = vector.broadcast %58 : vector<1x4xf32> to vector<128x4xf32>
    %60 = arith.addf %57, %59 : vector<128x4xf32>
    %cst_39 = arith.constant 0.000000e+00 : f32
    %61 = vector.broadcast %cst_39 : f32 to vector<128x4xf32>
    %62 = arith.maximumf %60, %61 : vector<128x4xf32>
    %c0_40 = arith.constant 0 : index
    %c0_41 = arith.constant 0 : index
    %63 = vector.load %arg9[%c0_40, %c0_41] : memref<4x16xf32, #tpu.memory_space<vmem>>, vector<4x16xf32>
    %cst_42 = arith.constant dense<0.000000e+00> : vector<128x16xf32>
    %64 = tpu.matmul %62, %63, %cst_42 {dimension_numbers = #tpu.dot_dimension_numbers<[1], [0], [0], [1], [0, 0, 1, 1], [], []>} : vector<128x4xf32>, vector<4x16xf32>, vector<128x16xf32> -> vector<128x16xf32>
    %c0_43 = arith.constant 0 : index
    %c0_44 = arith.constant 0 : index
    %65 = vector.load %arg10[%c0_43, %c0_44] : memref<1x16xf32, #tpu.memory_space<vmem>>, vector<1x16xf32>
    %66 = vector.broadcast %65 : vector<1x16xf32> to vector<128x16xf32>
    %67 = arith.addf %64, %66 : vector<128x16xf32>
    %c0_45 = arith.constant 0 : index
    %c0_46 = arith.constant 0 : index
    %c0_47 = arith.constant 0 : index
    %c0_48 = arith.constant 0 : index
    %68 = vector.load %arg2[%c0_45, %c0_46, %c0_47, %c0_48] : memref<1x8x16x16xf32, #tpu.memory_space<vmem>>, vector<1x8x16x16xf32>
    %69 = vector.shape_cast %68 : vector<1x8x16x16xf32> to vector<8x16x16xf32>
    %70 = vector.shape_cast %69 : vector<8x16x16xf32> to vector<128x16xf32>
    %71 = arith.addf %67, %70 : vector<128x16xf32>
    %cst_49 = arith.constant 0.000000e+00 : f32
    %72 = vector.broadcast %cst_49 : f32 to vector<128x16xf32>
    %73 = arith.maximumf %71, %72 : vector<128x16xf32>
    %74 = vector.shape_cast %73 : vector<128x16xf32> to vector<8x16x16xf32>
    %c0_50 = arith.constant 0 : index
    %c0_51 = arith.constant 0 : index
    %c0_52 = arith.constant 0 : index
    %c0_53 = arith.constant 0 : index
    %75 = vector.load %arg11[%c0_50, %c0_51, %c0_52, %c0_53] : memref<1x8x16x16xf32, #tpu.memory_space<vmem>>, vector<1x8x16x16xf32>
    %76 = vector.shape_cast %75 : vector<1x8x16x16xf32> to vector<8x16x16xf32>
    %77 = vector.shape_cast %74 : vector<8x16x16xf32> to vector<1x8x16x16xf32>
    tpu.vector_store %arg11[%c0_50, %c0_51, %c0_52, %c0_53], %77 {strides = array<i32>} : memref<1x8x16x16xf32, #tpu.memory_space<vmem>>, vector<1x8x16x16xf32>,
    return
  }
  func.func @transform_0(%arg0: i32, %arg1: i32) -> (i32, i32, i32, i32) {
    %c0_i32 = arith.constant 0 : i32
    %c0_i32_0 = arith.constant 0 : i32
    %c0_i32_1 = arith.constant 0 : i32
    return %arg0, %arg1, %c0_i32, %c0_i32_0 : i32, i32, i32, i32
  }
  func.func @transform_1(%arg0: i32, %arg1: i32) -> (i32, i32, i32, i32) {
    %c8_i32 = arith.constant 8 : i32
    %0 = arith.muli %arg1, %c8_i32 : i32
    %c1_i32 = arith.constant 1 : i32
    %1 = arith.subi %0, %c1_i32 : i32
    %c0_i32 = arith.constant 0 : i32
    %2 = arith.maxsi %1, %c0_i32 : i32
    %c0_i32_0 = arith.constant 0 : i32
    %c0_i32_1 = arith.constant 0 : i32
    %c0_i32_2 = arith.constant 0 : i32
    return %arg0, %2, %c0_i32_0, %c0_i32_1 : i32, i32, i32, i32
  }
  func.func @transform_2(%arg0: i32, %arg1: i32) -> (i32, i32, i32, i32) {
    %c1_i32 = arith.constant 1 : i32
    %0 = arith.addi %arg1, %c1_i32 : i32
    %c8_i32 = arith.constant 8 : i32
    %1 = arith.muli %0, %c8_i32 : i32
    %c15_i32 = arith.constant 15 : i32
    %2 = arith.minsi %1, %c15_i32 : i32
    %c0_i32 = arith.constant 0 : i32
    %c0_i32_0 = arith.constant 0 : i32
    %c0_i32_1 = arith.constant 0 : i32
    return %arg0, %2, %c0_i32, %c0_i32_0 : i32, i32, i32, i32
  }
  func.func @transform_3(%arg0: i32, %arg1: i32) -> (i32, i32) {
    %c0_i32 = arith.constant 0 : i32
    %c0_i32_0 = arith.constant 0 : i32
    %c0_i32_1 = arith.constant 0 : i32
    return %c0_i32, %c0_i32_0 : i32, i32
  }
  func.func @transform_4(%arg0: i32, %arg1: i32) -> (i32, i32) {
    %c0_i32 = arith.constant 0 : i32
    %c0_i32_0 = arith.constant 0 : i32
    %c0_i32_1 = arith.constant 0 : i32
    return %c0_i32, %c0_i32_0 : i32, i32
  }
  func.func @transform_5(%arg0: i32, %arg1: i32) -> (i32, i32, i32) {
    %c0_i32 = arith.constant 0 : i32
    %c0_i32_0 = arith.constant 0 : i32
    %c0_i32_1 = arith.constant 0 : i32
    %c0_i32_2 = arith.constant 0 : i32
    return %c0_i32, %c0_i32_0, %c0_i32_1 : i32, i32, i32
  }
  func.func @transform_6(%arg0: i32, %arg1: i32) -> (i32, i32) {
    %c0_i32 = arith.constant 0 : i32
    %c0_i32_0 = arith.constant 0 : i32
    %c0_i32_1 = arith.constant 0 : i32
    return %c0_i32, %c0_i32_0 : i32, i32
  }
  func.func @transform_7(%arg0: i32, %arg1: i32) -> (i32, i32) {
    %c0_i32 = arith.constant 0 : i32
    %c0_i32_0 = arith.constant 0 : i32
    %c0_i32_1 = arith.constant 0 : i32
    return %c0_i32, %c0_i32_0 : i32, i32
  }
  func.func @transform_8(%arg0: i32, %arg1: i32) -> (i32, i32) {
    %c0_i32 = arith.constant 0 : i32
    %c0_i32_0 = arith.constant 0 : i32
    %c0_i32_1 = arith.constant 0 : i32
    return %c0_i32, %c0_i32_0 : i32, i32
  }
  func.func @transform_9(%arg0: i32, %arg1: i32) -> (i32, i32, i32, i32) {
    %c0_i32 = arith.constant 0 : i32
    %c0_i32_0 = arith.constant 0 : i32
    %c0_i32_1 = arith.constant 0 : i32
    return %arg0, %arg1, %c0_i32, %c0_i32_0 : i32, i32, i32, i32
  }
}

</mosaic_0001>

<bundles_post_ra>
// kernel: tpu_custom_call.1
= control target key start
LH: loop header
LB: loop body
LE: loop exit
PB: predicated region body
PF: predicated region fallthrough
CT: control target
= control target key end

     0   :  { %s4143_s0 = inlined_call_operand.hbm [shape: f32[2,16,16,16], index: 0, kind: input, shape index: {}]   ;;  %s4144_s1 = inlined_call_operand.hbm [shape: f32[2,16,16,16], index: 1, kind: input, shape index: {}]   ;;  %s4145_s2 = inlined_call_operand.hbm [shape: f32[2,16,16,16], index: 2, kind: input, shape index: {}]   ;;  %s4146_s3 = inlined_call_operand.vmem [shape: f32[16,4], index: 3, kind: input, shape index: {}]   ;;  %s4147_s4 = inlined_call_operand.vmem [shape: f32[1,4], index: 4, kind: input, shape index: {}]   ;;  %s4148_s5 = inlined_call_operand.vmem [shape: f32[3,12,4], index: 5, kind: input, shape index: {}]   ;;  %s4149_s6 = inlined_call_operand.vmem [shape: f32[1,4], index: 6, kind: input, shape index: {}]   ;;  %s4150_s7 = inlined_call_operand.vmem [shape: f32[4,16], index: 7, kind: input, shape index: {}]   ;;  %s4151_s8 = inlined_call_operand.vmem [shape: f32[1,16], index: 8, kind: input, shape index: {}]   ;;  %s4152_s9 = inlined_call_operand.hbm [shape: f32[2,16,16,16], index: 9, kind: output, shape index: {}]  }
   0x1   :  { %4182 = sst [smem:[#allocation25_spill]] %s4143_s0 }
   0x2   :  { %4183 = sst [smem:[#allocation26_spill]] %s4144_s1 }
   0x3   :  { %4184 = sst [smem:[#allocation27_spill]] %s4145_s2 }
   0x4   :  { %4185 = sst [smem:[#allocation28_spill]] %s4146_s3 }
   0x5   :  { %4186 = sst [smem:[#allocation29_spill]] %s4147_s4 }
   0x6   :  { %4187 = sst [smem:[#allocation30_spill]] %s4148_s5 }
   0x7   :  { %4188 = sst [smem:[#allocation31_spill]] %s4149_s6 }
   0x8   :  { %4189 = sst [smem:[#allocation32_spill]] %s4150_s7 }
   0x9   :  { %4190 = sst [smem:[#allocation33_spill]] %s4151_s8 }
   0xa   :  { %4191 = sst [smem:[#allocation34_spill]] %s4152_s9 }
   0xb   :  { %14 = vsyncpa [#allocation3], 0 }
   0xc   :  { %16 = vsyncpa [#allocation3 + $0x1], 0 }
   0xd   :  { %17 = vsyncpa [#allocation6], 0 }
   0xe   :  { %19 = vsyncpa [#allocation6 + $0x1], 0 }
   0xf   :  { %20 = vsyncpa [#allocation4], 0 }
  0x10   :  { %22 = vsyncpa [#allocation4 + $0x1], 0  ;;  %s3015_s30 = smov 0   ;;  %s3017_s10 = smov 0  }
  0x11   :  { %s3019_s11 = smov 0   ;;  %s3021_s12 = smov 0  }
  0x12   :  { %s3023_s13 = smov 0   ;;  %s3025_s14 = smov 0  }
  0x13   :  { %s3027_s15 = smov 0   ;;  %s3029_s16 = smov 0  }
  0x14   :  { %s3031_s17 = smov 0   ;;  %s3033_s18 = smov 0  }
  0x15   :  { %s3035_s19 = smov 0   ;;  %s3037_s20 = smov 0  }
  0x16   :  { %s3039_s21 = smov 0   ;;  %s3041_s22 = smov 0  }
  0x17 LB: > { %4192 = sst [smem:[#allocation13_spill]] %s2917_s13  ;;  %s3086_s23 = sadd.s32 4294967295, %s2953_s22   ;;  %s2953_s22 = sphi %s3041_s22, %s28_s22   ;;  %s2949_s21 = sphi %s3039_s21, %s4265_s21   ;;  %s2945_s20 = sphi %s3037_s20, %s4264_s20   ;;  %s2941_s19 = sphi %s3035_s19, %s4263_s19   ;;  %s2937_s18 = sphi %s3033_s18, %s4262_s18   ;;  %s2933_s17 = sphi %s3031_s17, %s4261_s17   ;;  %s2929_s16 = sphi %s3029_s16, %s4272_s16   ;;  %s2925_s15 = sphi %s3027_s15, %s4271_s15   ;;  %s2921_s14 = sphi %s3025_s14, %s4270_s14   ;;  %s2917_s13 = sphi %s3023_s13, %s4269_s13   ;;  %s2913_s12 = sphi %s3021_s12, %s4258_s12   ;;  %s2909_s11 = sphi %s3019_s11, %s4268_s11   ;;  %s2905_s10 = sphi %s3017_s10, %s4267_s10   ;;  %s2901_s30 = sphi %s3015_s30, %s4266_s30  }
  0x18   : > { %4193 = sst [smem:[#allocation14_spill]] %s2933_s17  ;;  %s37_s24 = sadd.s32 1, %s2945_s20 }
  0x19   : > { %4194 = sst [smem:[#allocation15_spill]] %s2937_s18  ;;  %p38_p0 = scmp.ge.s32.totalorder %s37_s24, 2 }
  0x1a   : > { %4195 = sst [smem:[#allocation16_spill]] %s2941_s19  ;;  %s40_s25 = sadd.s32 1, %s2949_s21 }
  0x1b   : > { %4196 = sst [smem:[#allocation17_spill]] %s2945_s20  ;;  %p4166_p1 = scmp.eq.s32.totalorder %s2953_s22, 0 }
  0x1c   : > { %4197 = sst [smem:[#allocation18_spill]] %s2949_s21  ;;  %p4165_p2 = scmp.eq.s32.totalorder %s3086_s23, 0 }
  0x1d   : > { %s4274_s24 = smov (%p38_p0, %s37_s24), 0  ;;  %s4276_s25 = smov (!%p38_p0, %s40_s25), %s2949_s21 }
  0x1e   : > { %4198 = sst [smem:[#allocation19_spill]] %s4274_s24  ;;  %s45_s26 = ssub.s32 %s2945_s20, %s4274_s24 }
  0x1f   : > { %s2122_s27 = sshll.u32 %s2945_s20, 3  ;;  %p42_p3 = scmp.ge.s32.totalorder %s4276_s25, 2 }
  0x20   : > { %s2123_s28 = sadd.s32 4294967295, %s2122_s27  ;;  %s2124_s29 = sshll.u32 %s4274_s24, 3 }
  0x21   : > { %p74_p4 = scmp.gt.s32.totalorder %s2123_s28, 0  ;;  %s4278_s25 = smov (%p42_p3, %s4276_s25), 0 }
  0x22   : > { %4199 = sst [smem:[#allocation20_spill]] %s4278_s25  ;;  %s3103_s9 = ssub.s32 %s2949_s21, %s4278_s25 }
  0x23   : > { %s4280_s28 = smov (!%p74_p4, %s2123_s28), 0  ;;  %4200 = sst [smem:[#allocation21_spill]] %s3103_s9 }
  0x24   : > { %s2125_s19 = sadd.s32 4294967295, %s2124_s29  ;;  %s3106_s8 = sor.u32 %s45_s26, %s3103_s9 }
  0x25   : > { %p78_p5 = scmp.gt.s32.totalorder %s2125_s19, 0  ;;  %s85_s6 = sadd.s32 1, %s2921_s14 }
  0x26   : > { %p92_p7 = scmp.ne.s32.totalorder %s2921_s14, %s2917_s13  ;;  %p98_p8 = scmp.ne.s32.totalorder %s2917_s13, %s2913_s12 }
  0x27   : > { %s4282_s19 = smov (!%p78_p5, %s2125_s19), 0  ;;  %s3114_s25 = sadd.s32 8, %s2122_s27 }
  0x28   : > { %s81_s24 = ssub.s32 %s4280_s28, %s4282_s19  ;;  %p3119_p9 = por %p92_p7, %p4166_p1 }
  0x29   : > { %s82_s7 = sor.u32 %s81_s24, %s3103_s9  ;;  %p3125_p11 = por %p98_p8, %p4165_p2 }
  0x2a   : > { %p83_p10 = scmp.eq.s32.totalorder %s82_s7, 0  ;;  %s3130_s12 = sadd.s32 8, %s2124_s29 }
  0x2b   : > { %s4202_s4 = scalar_select %p3125_p11, 1, 0 }
  0x2c   : > { %s3133_s19 = scalar_select %p83_p10, %s2921_s14, %s85_s6  }
  0x2d   : > { %4203 = sst [smem:[#allocation22_spill]] %s4202_s4  ;;  %p4164_p0 = scmp.lt.s32.totalorder %s2953_s22, 4 }
  0x2e   : > { %4204 = sst [smem:[#allocation23_spill]] %s3133_s19  ;;  %s3138_s24 = sshll.u32 %s2949_s21, 5 }
  0x2f   : > { %s354_s7 = sand.u32 1, %s2953_s22   ;;  %s356_s27 = sand.u32 1, %s2921_s14  }
  0x30   : > { %s2135_s5 = sshll.u32 %s356_s27, 4  ;;  %s2138_s18 = sshll.u32 %s4280_s28, 1 }
  0x31   : > { %s368_s3 = sadd.s32 %s2138_s18, %s3138_s24  ;;  %s358_s4 = scalar_lea.vmem [#allocation5], %s2135_s5 }
  0x32   : > { %s371_s13 = sshll.u32 %s358_s4, 4  ;;  %s2140_s2 = sshll.u32 %s368_s3, 7  ;;  %s3143_s13 = int_to_ptr.vmem [resolvable:$true] %s371_s13 }
  0x33   : > { %s4205_s1 = sld [smem:[#allocation26_spill]]  ;;  %p3154_p3 = pnand %p4164_p0, %p3119_p9 }
  0x34   : > { %s3160_s3 = scalar_lea.sflag [#allocation6], %s354_s7 }
  0x35   : > { %p2711_p8 = pneg %p3154_p3 }
  0x39   : > { %s3148_s6 = scalar_lea.hbm %s4205_s1, %s2140_s2  ;;  %s2714_s9 = scalar_lea.hbm %s4205_s1, 8192 }
  0x3a   : > { %s2709_s4 = scalar_lea.hbm %s3148_s6, 256  ;;  %p2715_p9 = scmp.lt.u32.totalorder %s3148_s6, %s4205_s1 }
  0x3b   : > { %p2710_p7 = scmp.ne.s32.totalorder %s3148_s6, %s2709_s4  ;;  %p2716_p12 = scmp.lt.u32.totalorder %s2714_s9, %s2709_s4 }
  0x3c   : > { %p2718_p2 = scmp.lt.u32.totalorder %s2709_s4, %s3148_s6 }
  0x3d   : > { %p2712_p10 = pnand %p2711_p8, %p2710_p7  ;;  %p2717_p0 = por %p2716_p12, %p2715_p9 }
  0x3f   : > { %p2713_p13 = pneg %p2712_p10  ;;  %p2719_p1 = por %p2718_p2, %p2717_p0 }
  0x41   : > { %p2720_p6 = pnand %p2719_p1, %p2713_p13 }
  0x43   : > { %2723 = shalt.err (!%p2720_p6)
}
  0x44   : > { %s2724_s26 = scalar_lea.vmem %s3143_s13, 256  ;;  %s2955_s7 = smov [#allocation5]  }
  0x45   : > { %p2725_p7 = scmp.ne.s32.totalorder %s3143_s13, %s2724_s26  ;;  %s2729_s29 = sshll.u32 %s2955_s7, 4  ;;  %s2730_s29 = int_to_ptr.vmem [resolvable:$false] %s2729_s29 }
  0x46   : > { %s2731_s2 = scalar_lea.vmem %s2730_s29, 512  ;;  %p2732_p5 = scmp.lt.s32.totalorder %s3143_s13, %s2730_s29 }
  0x47   : > { %p2727_p10 = pnand %p2725_p7, %p2711_p8  ;;  %p2733_p12 = scmp.lt.s32.totalorder %s2731_s2, %s2724_s26 }
  0x49   : > { %p2728_p4 = pneg %p2727_p10  ;;  %p2734_p9 = por %p2733_p12, %p2732_p5 }
  0x4b   : > { %p2735_p2 = pnand %p2734_p9, %p2728_p4 }
  0x4d   : > { %2738 = shalt.err (!%p2735_p2)
}
  0x4e   : > { %s4167_s4 = smov 128   ;;  %s4169_s5 = smov 8  }
  0x4f   : > { %2578 = dma.hbm_to_vmem [thread:$0]  (!%p3154_p3), %s3148_s6, 256, %s3143_s13, %s3160_s3, %s4167_s4, %s4167_s4, %s4169_s5  }
  0x50   : > { %p4207_p1 = scmp.lt.s32.totalorder %s2953_s22, 5  ;;  %p4208_p6 = scmp.ge.s32.totalorder %s2953_s22, 1 }
  0x51   : > { %s2121_s18 = sadd.s32 4294967294, %s2953_s22   ;;  %s49_s28 = sadd.s32 1, %s2933_s17 }
  0x52   : > { %p3195_p13 = pnand %p4208_p6, %p4207_p1  ;;  %p4210_p0 = scmp.eq.s32.totalorder %s3106_s8, 0 }
  0x53   : > { %p56_p4 = scmp.ne.s32.totalorder %s2933_s17, %s2929_s16  ;;  %p62_p5 = scmp.ne.s32.totalorder %s2929_s16, %s2925_s15 }
  0x54   : > { %s3204_s26 = scalar_select %p4210_p0, %s2933_s17, %s49_s28  }
  0x55   : > { %p286_p8 = scmp.eq.s32.totalorder %s3086_s23, 3  ;;  %p292_p7 = scmp.eq.s32.totalorder %s2121_s18, 3 }
  0x56   : > { %4211 = sst [smem:[#allocation24_spill]] %s3204_s26  ;;  %p4212_p10 = scmp.eq.s32.totalorder %s2953_s22, 0 }
  0x57   : > { %p4214_p3 = scmp.eq.s32.totalorder %s3086_s23, 0  ;;  %p3223_p2 = por %p286_p8, %p56_p4 }
  0x58   : > { %p3213_p12 = por %p4212_p10, %p56_p4  ;;  %p3227_p1 = por %p292_p7, %p62_p5 }
  0x59   : > { %p3219_p9 = por %p4214_p3, %p62_p5  ;;  %s330_s7 = sand.u32 1, %s2933_s17  }
  0x5a   : > { %s4216_s8 = scalar_select %p3223_p2, 1, 0 }
  0x5b   : > { %s4215_s6 = scalar_select %p3219_p9, 1, 0 }
  0x5c   : > { %s4217_s27 = scalar_select %p3227_p1, 1, 0 }
  0x5d   : > { %s2257_s29 = sshll.u32 %s2945_s20, 4  ;;  %s2130_s2 = sshll.u32 %s330_s7, 7 }
  0x5e   : > { %s341_s18 = sadd.s32 %s2257_s29, %s3138_s24  ;;  %s334_s4 = scalar_lea.vmem [#allocation2], %s2130_s2 }
  0x5f   : > { %s2134_s28 = sshll.u32 %s341_s18, 7  ;;  %s344_s5 = sshll.u32 %s334_s4, 4  ;;  %s3239_s5 = int_to_ptr.vmem [resolvable:$true] %s344_s5 }
  0x60   : > { %s4218_s0 = sld [smem:[#allocation25_spill]]  ;;  %p4219_p6 = scmp.lt.s32.totalorder %s2953_s22, 4 }
  0x61   : > { %s3249_s4 = scalar_lea.sflag [#allocation3], %s330_s7 }
  0x62   : > { %p3245_p0 = pnand %p4219_p6, %p3213_p12 }
  0x64   : > { %p2741_p5 = pneg %p3245_p0 }
  0x66   : > { %s3237_s26 = scalar_lea.hbm %s4218_s0, %s2134_s28  ;;  %s2744_s13 = scalar_lea.hbm %s4218_s0, 8192 }
  0x67   : > { %s2739_s29 = scalar_lea.hbm %s3237_s26, 2048  ;;  %p2745_p10 = scmp.lt.u32.totalorder %s3237_s26, %s4218_s0 }
  0x68   : > { %p2740_p4 = scmp.ne.s32.totalorder %s3237_s26, %s2739_s29  ;;  %p2746_p12 = scmp.lt.u32.totalorder %s2744_s13, %s2739_s29 }
  0x69   : > { %p2748_p6 = scmp.lt.u32.totalorder %s2739_s29, %s3237_s26 }
  0x6a   : > { %p2742_p8 = pnand %p2741_p5, %p2740_p4  ;;  %p2747_p3 = por %p2746_p12, %p2745_p10 }
  0x6c   : > { %p2743_p7 = pneg %p2742_p8  ;;  %p2749_p1 = por %p2748_p6, %p2747_p3 }
  0x6e   : > { %p2750_p2 = pnand %p2749_p1, %p2743_p7 }
  0x70   : > { %2753 = shalt.err (!%p2750_p2)
}
  0x71   : > { %s2754_s7 = scalar_lea.vmem %s3239_s5, 2048  ;;  %s2958_s28 = smov [#allocation2]  }
  0x72   : > { %p2755_p4 = scmp.ne.s32.totalorder %s3239_s5, %s2754_s7  ;;  %s2759_s1 = sshll.u32 %s2958_s28, 4  ;;  %s2760_s1 = int_to_ptr.vmem [resolvable:$false] %s2759_s1 }
  0x73   : > { %s2761_s21 = scalar_lea.vmem %s2760_s1, 4096  ;;  %p2762_p9 = scmp.lt.s32.totalorder %s3239_s5, %s2760_s1 }
  0x74   : > { %p2757_p8 = pnand %p2755_p4, %p2741_p5  ;;  %p2763_p10 = scmp.lt.s32.totalorder %s2761_s21, %s2754_s7 }
  0x76   : > { %p2758_p11 = pneg %p2757_p8  ;;  %p2764_p12 = por %p2763_p10, %p2762_p9 }
  0x78   : > { %p2765_p3 = pnand %p2764_p12, %p2758_p11 }
  0x7a   : > { %2768 = shalt.err (!%p2765_p3)
}
  0x7b   : > { %s4221_s29 = smov 8   ;;  %s4222_s13 = smov 128  }
  0x7c   : > { %s4223_s2 = sld [smem:[#allocation21_spill]]  ;;  %p4224_p11 = scmp.lt.s32.totalorder %s3114_s25, 15 }
  0x7d   : > { %2575 = dma.hbm_to_vmem [thread:$0]  (!%p3245_p0), %s3237_s26, 2048, %s3239_s5, %s3249_s4, %s4222_s13, %s4222_s13, %s4221_s29  }
  0x7e   : > { %s4284_s25 = smov (!%p4224_p11, %s3114_s25), 15  ;;  %p4225_p9 = scmp.lt.s32.totalorder %s3130_s12, 15 }
  0x7f   : > { %s121_s20 = sadd.s32 1, %s2909_s11  ;;  %p128_p2 = scmp.ne.s32.totalorder %s2909_s11, %s2905_s10 }
  0x80   : > { %s4286_s12 = smov (!%p4225_p9, %s3130_s12), 15  ;;  %p134_p1 = scmp.ne.s32.totalorder %s2905_s10, %s2901_s30 }
  0x81   : > { %s117_s18 = ssub.s32 %s4284_s25, %s4286_s12  ;;  %p4226_p5 = scmp.eq.s32.totalorder %s2953_s22, 0 }
  0x82   : > { %s118_s7 = sor.u32 %s117_s18, %s4223_s2  ;;  %p4228_p4 = scmp.eq.s32.totalorder %s3086_s23, 0 }
  0x83   : > { %p3294_p7 = por %p128_p2, %p4226_p5  ;;  %p119_p6 = scmp.eq.s32.totalorder %s118_s7, 0 }
  0x84   : > { %p3300_p8 = por %p134_p1, %p4228_p4  ;;  %s383_s26 = sand.u32 1, %s2909_s11  }
  0x85   : > { %s2143_s4 = sshll.u32 %s4284_s25, 1  ;;  %s2141_s12 = sshll.u32 %s383_s26, 4 }
  0x86   : > { %s4229_s5 = scalar_select %p3300_p8, 1, 0 }
  0x87   : > { %s3306_s1 = scalar_select %p119_p6, %s2909_s11, %s121_s20  }
  0x88   : > { %s395_s21 = sadd.s32 %s2143_s4, %s3138_s24  ;;  %s4230_s0 = sld [smem:[#allocation27_spill]] }
  0x89   : > { %s2145_s30 = sshll.u32 %s395_s21, 7  ;;  %s385_s7 = scalar_lea.vmem [#allocation7], %s2141_s12 }
  0x8a   : > { %s398_s19 = sshll.u32 %s385_s7, 4  ;;  %p4231_p0 = scmp.lt.s32.totalorder %s2953_s22, 4  ;;  %s3314_s19 = int_to_ptr.vmem [resolvable:$true] %s398_s19 }
  0x8c   : > { %p3320_p10 = pnand %p4231_p0, %p3294_p7 }
  0x8e   : > { %s3312_s17 = scalar_lea.hbm %s4230_s0, %s2145_s30  ;;  %p2771_p3 = pneg %p3320_p10 }
  0x8f   : > { %s2769_s24 = scalar_lea.hbm %s3312_s17, 256  ;;  %s2774_s4 = scalar_lea.hbm %s4230_s0, 8192 }
  0x90   : > { %p2770_p12 = scmp.ne.s32.totalorder %s3312_s17, %s2769_s24  ;;  %p2775_p2 = scmp.lt.u32.totalorder %s3312_s17, %s4230_s0 }
  0x91   : > { %p2776_p1 = scmp.lt.u32.totalorder %s2774_s4, %s2769_s24  ;;  %p2778_p7 = scmp.lt.u32.totalorder %s2769_s24, %s3312_s17 }
  0x92   : > { %p2772_p11 = pnand %p2771_p3, %p2770_p12 }
  0x93   : > { %p2777_p5 = por %p2776_p1, %p2775_p2 }
  0x94   : > { %p2773_p9 = pneg %p2772_p11 }
  0x95   : > { %p2779_p6 = por %p2778_p7, %p2777_p5 }
  0x97   : > { %p2780_p4 = pnand %p2779_p6, %p2773_p9 }
  0x99   : > { %2783 = shalt.err (!%p2780_p4)
}
  0x9a   : > { %s2784_s21 = scalar_lea.vmem %s3314_s19, 256  ;;  %s2959_s30 = smov [#allocation7]  }
  0x9b   : > { %p2785_p0 = scmp.ne.s32.totalorder %s3314_s19, %s2784_s21  ;;  %s2789_s2 = sshll.u32 %s2959_s30, 4  ;;  %s2790_s2 = int_to_ptr.vmem [resolvable:$false] %s2789_s2 }
  0x9c   : > { %s2791_s18 = scalar_lea.vmem %s2790_s2, 512  ;;  %p2792_p8 = scmp.lt.s32.totalorder %s3314_s19, %s2790_s2 }
  0x9d   : > { %p2787_p12 = pnand %p2785_p0, %p2771_p3  ;;  %p2793_p2 = scmp.lt.s32.totalorder %s2791_s18, %s2784_s21 }
  0x9f   : > { %p2788_p11 = pneg %p2787_p12  ;;  %p2794_p1 = por %p2793_p2, %p2792_p8 }
  0xa1   : > { %p2795_p5 = pnand %p2794_p1, %p2788_p11 }
  0xa3   : > { %2798 = shalt.err (!%p2795_p5)
}
  0xa4   : > { %2581 = dma.hbm_to_vmem [thread:$0]  (!%p3320_p10), %s3312_s17, 256, %s3314_s19, %s3160_s3, %s4222_s13, %s4222_s13, %s4221_s29  }
  0xa5   : > { %410 = sbr.rel (%p3195_p13) target bundleno = 1097 (0x449), region = 56  ;;  %s3356_s7 = sand.u32 (!%p3195_p13), 1, %s2929_s16  }
  0xa6   : > { %s2147_s24 = sshll.u32 (!%p3195_p13), %s3356_s7, 7  ;;  %s413_s20 = scalar_lea.sflag (!%p3195_p13), [#allocation3], %s3356_s7 }
  0xa7   : > { %s3362_s25 = scalar_lea.vmem (!%p3195_p13), [#allocation2], %s2147_s24  ;;  %p4233_p8 = scmp.ne.s32.totalorder (!%p3195_p13), %s4215_s6, 0 }
  0xac   : > { %2884 = dma.done.wait (%p4233_p8), %s413_s20, 2048  }
  0xad   : > { %2886 = vsyncadd (%p4233_p8), %s413_s20, 4294965248  ;;  %s4234_s17 = sld [smem:[#allocation13_spill]]  ;;  %s4235_s19 = sld [smem:[#allocation22_spill]] }
  0xae   : > { %s421_s3 = sand.u32 1, %s3086_s23  }
  0xaf   : > { %s422_s13 = scalar_lea.sflag [#allocation6], %s421_s3 }
  0xb3   : > { %s423_s9 = sand.u32 1, %s4234_s17   ;;  %p4236_p13 = scmp.ne.s32.totalorder %s4235_s19, 0 }
  0xb4   : > { %s2148_s29 = sshll.u32 %s423_s9, 4 }
  0xb5   : > { %s425_s26 = scalar_lea.vmem [#allocation5], %s2148_s29 }
  0xb6   : > { %2888 = dma.done.wait (%p4236_p13), %s422_s13, 256  }
  0xb7   : > { %2890 = vsyncadd (%p4236_p13), %s422_s13, 4294967040  ;;  %s432_s4 = sand.u32 1, %s2905_s10   ;;  %p4237_p10 = scmp.ne.s32.totalorder %s4229_s5, 0 }
  0xb8   : > { %s2149_s28 = sshll.u32 %s432_s4, 4 }
  0xb9   : > { %s434_s12 = scalar_lea.vmem [#allocation7], %s2149_s28 }
  0xba   : > { %2892 = dma.done.wait (%p4237_p10), %s422_s13, 256  }
  0xbb   : > { %2894 = vsyncadd (%p4237_p10), %s422_s13, 4294967040  ;;  %vm514_vm0 = vcmask 130048   ;;  %s4238_s21 = sld [smem:[#allocation28_spill]]  ;;  %v3386_v2 = vld [vmem:[%s3362_s25] sm:$0xff]  ;;  %v3392_v5 = vld [vmem:[%s3362_s25 + $0x8] sm:$0xff]  ;;  %s4240_s5 = sld [smem:[#allocation15_spill]] }
  0xbc   : > { %2360 = vmatprep.mubr.msk.f32.mxu0 %vm514_vm0, %v3386_v2  ;;  %v724_v4 = vld [vmem:[%s425_s26] sm:$0xff]  ;;  %v725_v6 = vld [vmem:[%s425_s26 + $0x8] sm:$0xff]  ;;  %s4241_s19 = sld [smem:[#allocation30_spill]]  ;;  %vm1197_vm1 = vcmask 1043456   ;;  %s4243_s4 = sld [smem:[#allocation29_spill]]  ;;  %vm2960_vm2 = vmmov 1  }
  0xbd   : > { %2388 = vmatprep.mubr.msk.f32.mxu1 %vm514_vm0, %v724_v4  ;;  %v3395_v7 = vld [vmem:[%s3362_s25 + $0x10] sm:$0xff]  ;;  %v3403_v9 = vld [vmem:[%s3362_s25 + $0x18] sm:$0xff]  ;;  %v3407_v11 = vld [vmem:[%s3362_s25 + $0x20] sm:$0xff]  ;;  %vm920_vm4 = vcmask 1046528   ;;  %vm859_vm5 = vcmask 1040384   ;;  %s2962_s6 = smov 8  }
  0xbe   : > { %v726_v8 = vld [vmem:[%s434_s12] sm:$0xff]  ;;  %v727_v10 = vld [vmem:[%s434_s12 + $0x8] sm:$0xff]  ;;  %vm3475_vm3 = vmpackc.low %vm1197_vm1, %vm2960_vm2  ;;  %s2961_s12 = smov 4   ;;  %vm1101_vm6 = vcmask 31744   ;;  %vm1122_vm7 = vcmask 64512   ;;  %vm1148_vm8 = vcmask 97280  }
  0xbf   : > { %v3415_v12 = vld [vmem:[%s3362_s25 + $0x28] sm:$0xff]  ;;  %v3418_v13 = vld [vmem:[%s3362_s25 + $0x30] sm:$0xff]  ;;  %v3425_v14 = vld [vmem:[%s3362_s25 + $0x38] sm:$0xff]  ;;  %s4252_s18 = sld [smem:[#allocation33_spill]]  ;;  %s3996_s20 = scalar_lea.vmem [#allocation8], %s2147_s24 }
  0xc0   : > { %v3428_v15 = vld [vmem:[%s3362_s25 + $0x40] sm:$0xff]  ;;  %v3435_v16 = vld [vmem:[%s3362_s25 + $0x48] sm:$0xff]  ;;  %v3438_v17 = vld [vmem:[%s3362_s25 + $0x50] sm:$0xff]  ;;  %s4253_s24 = sld [smem:[#allocation16_spill]]  ;;  %p4255_p6 = scmp.ne.s32.totalorder %s4216_s8, 0 }
  0xc1   : > { %s4239_s2 = smov %s4238_s21  ;;  %v505_v0 = vld [vmem:[%s4238_s21] sm:$0xff]  ;;  %v3445_v18 = vld [vmem:[%s3362_s25 + $0x58] sm:$0xff]  ;;  %v3452_v20 = vld [vmem:[%s3362_s25 + $0x68] sm:$0xff]  ;;  %p829_p3 = scmp.gt.s32.totalorder %s4240_s5, 0 }
  0xc2   : > { %v506_v1 = vld [vmem:[%s4239_s2 + $0x8] sm:$0xff]  ;;  %v501_v19 = vld [vmem:[%s3362_s25 + $0x60] sm:$0xff]  ;;  %v503_v21 = vld [vmem:[%s3362_s25 + $0x70] sm:$0xff]  ;;  %s4242_s3 = smov %s4241_s19  ;;  %p831_p9 = scmp.lt.s32.totalorder %s4240_s5, 1 }
  0xc3   : > { %v2504_v3 = vpack.c.bf16 %v506_v1, %v505_v0  ;;  %v504_v22 = vld [vmem:[%s3362_s25 + $0x78] sm:$0xff]  ;;  %v2172_v23 = vld [vmem:[%s4241_s19 + $0x10] sm:$0xff]  ;;  %v3470_v25 = vld [vmem:[%s4243_s4] ss:$0 sm:$0xff]  ;;  %s3472_s28 = scalar_select %p829_p3, 1.0, 0.0 }
  0xc4   : > { %v2173_v24 = vld [vmem:[%s4242_s3 + $0x18] sm:$0xf]  ;;  %s3501_s23 = scalar_select %p831_p9, 1.0, 0.0 }
  0xc5   : > { %2505 = vmatprep.subr.bf16.mxu0 %v2504_v3  ;;  %2509 = vmatprep.subr.bf16.mxu1 %v2504_v3  ;;  %v2512_v26 = vpack.c.bf16 %v2173_v24, %v2172_v23  ;;  %v833_v35 = vstv %s3472_s28  ;;  %s4250_s4 = sld [smem:[#allocation32_spill]]  ;;  %s2260_s17 = sshll.u32 %s4240_s5, 4 }
  0xc6   : > { %2507 = vmatpush3.bf16.msra.mxu0 %v2504_v3  ;;  %2511 = vmatpush3.bf16.msra.mxu1 %v2504_v3  ;;  %v836_v62 = vstv %s3501_s23  ;;  %s4251_s23 = sld [smem:[#allocation31_spill]]  ;;  %s2249_s19 = sshll.u32 %s4253_s24, 5 }
  0xc7   : > { %2514 = vmatprep.subr.msk.bf16.mxu0 %vm3475_vm3, %v2512_v26  ;;  %2530 = vmatprep.subr.msk.bf16.mxu1 %vm3475_vm3, %v2512_v26  ;;  %s1978_s9 = sadd.s32 %s2260_s17, %s2249_s19  ;;  %s1981_s5 = sshll.u32 %s3996_s20, 4  ;;  %s4055_s5 = int_to_ptr.vmem [resolvable:$true] %s1981_s5 }
  0xc8   : > { %s2250_s29 = sshll.u32 %s1978_s9, 7 }
  0xc9   : > { %2361 = vmatmul.mubr.msk.f32.vlgmr.msra.gmra.mrb[0].mxu0 %vm514_vm0, %v3392_v5  ;;  %2389 = vmatmul.mubr.msk.f32.vlgmr.msra.gmra.mrb[0].mxu1 %vm514_vm0, %v725_v6 }
  0xca   : > { %2363 = vmatprep.mubr.msk.f32.mxu0 %vm514_vm0, %v3395_v7  ;;  %2391 = vmatprep.mubr.msk.f32.mxu1 %vm514_vm0, %v726_v8 }
  0xcb   : > { %2517 = vmatpush3.bf16.msk.msra.mxu0 %vm3475_vm3, %v2512_v26  ;;  %2531 = vmatpush3.bf16.msk.msra.mxu1 %vm3475_vm3, %v2512_v26 }
  0xcd   : > { %2364 = vmatmul.mubr.msk.f32.gmra.mrb[2].mxu0 %vm514_vm0, %v3403_v9  ;;  %2392 = vmatmul.mubr.msk.f32.gmra.mrb[2].mxu1 %vm514_vm0, %v727_v10 }
  0xce   : > { %2366 = vmatprep.mubr.msk.f32.mxu0 %vm514_vm0, %v3407_v11 }
  0xd1   : > { %2367 = vmatmul.mubr.msk.f32.gmra.mrb[4].mxu0 %vm514_vm0, %v3415_v12 }
  0xd2   : > { %2369 = vmatprep.mubr.msk.f32.mxu0 %vm514_vm0, %v3418_v13 }
  0xd5   : > { %2370 = vmatmul.mubr.msk.f32.gmra.mrb[6].mxu0 %vm514_vm0, %v3425_v14 }
  0xd6   : > { %2372 = vmatprep.mubr.msk.f32.mxu0 %vm514_vm0, %v3428_v15 }
  0xd9   : > { %2373 = vmatmul.mubr.msk.f32.gmra.mrb[8].mxu0 %vm514_vm0, %v3435_v16 }
  0xda   : > { %2375 = vmatprep.mubr.msk.f32.mxu0 %vm514_vm0, %v3438_v17 }
  0xdd   : > { %2376 = vmatmul.mubr.msk.f32.gmra.mrb[10].mxu0 %vm514_vm0, %v3445_v18 }
  0xde   : > { %2378 = vmatprep.mubr.msk.f32.mxu0 %vm514_vm0, %v501_v19 }
  0xe1   : > { %2379 = vmatmul.mubr.msk.f32.gmra.mrb[12].mxu0 %vm514_vm0, %v3452_v20 }
  0xe2   : > { %2381 = vmatprep.mubr.msk.f32.mxu0 %vm514_vm0, %v503_v21 }
  0xe5   : > { %2382 = vmatmul.mubr.msk.f32.gmra.mrb[14].mxu0 %vm514_vm0, %v504_v22 }
 0x19c   : > { %v2362_v28 = vpop.f32.mrb[0].mxu0  ;;  %v2390_v29 = vpop.f32.mrb[0].mxu1 }
 0x19d   : > { %v635_v30 = vadd.f32 %v2362_v28, %v3470_v25  ;;  %v629_v31 = vpop.f32.mrb[1].mxu0  ;;  %v812_v32 = vadd.f32 %v2390_v29, %v3470_v25  ;;  %v806_v33 = vpop.f32.mrb[1].mxu1 }
 0x19e   : > { %v630_v34 = vadd.f32 %v3470_v25, %v629_v31  ;;  %v807_v36 = vadd.f32 %v3470_v25, %v806_v33 }
 0x19f   : > { %v709_v37 = vmax.f32 %v635_v30, 0.0  ;;  %v826_v38 = vmax.f32 %v812_v32, 0.0 }
 0x1a0   : > { %v3493_v39 = vmax.f32 %v630_v34, 0.0  ;;  %v825_v40 = vmax.f32 %v807_v36, 0.0  ;;  %v2365_v41 = vpop.f32.mrb[2].mxu0  ;;  %v2393_v42 = vpop.f32.mrb[2].mxu1 }
 0x1a1   : > { %v3495_v43 = vmul.f32 %v833_v35, %v826_v38  ;;  %977 = vrot.lane.b32.xlu1 %v709_v37, %s2961_s12  ;;  %v645_v44 = vadd.f32 %v2365_v41, %v3470_v25  ;;  %v639_v45 = vpop.f32.mrb[3].mxu0  ;;  %v925_v46 = vrot.slane %v709_v37, 1  ;;  %v816_v47 = vpop.f32.mrb[3].mxu1  ;;  %v864_v51 = vrot.slane %v709_v37, 7 }
 0x1a2   : > { %v924_v48 = vrot.slane %v3493_v39, 1  ;;  %v3504_v49 = vmul.f32 %v833_v35, %v825_v40  ;;  %975 = vrot.lane.b32.xlu0 %v3493_v39, %s2961_s12  ;;  %v640_v50 = vadd.f32 %v3470_v25, %v639_v45  ;;  %v863_v54 = vrot.slane %v3493_v39, 7 }
 0x1a3   : > { %v3509_v52 = vmax.f32 %v645_v44, 0.0  ;;  %v922_v53 = vrot.slane %v3495_v43, 1  ;;  %v861_v63 = vrot.slane %v3495_v43, 7  ;;  %v822_v8 = vadd.f32 %v2393_v42, %v3470_v25 }
 0x1a4   : > { %v3513_v55 = vmax.f32 %v640_v50, 0.0  ;;  %v2368_v56 = vpop.f32.mrb[4].mxu0  ;;  %v926_v57 = vsel %vm920_vm4, %v924_v48, %v925_v46  ;;  %v921_v58 = vrot.slane %v3504_v49, 1  ;;  %v4181_v4 = vrot.slane %v3504_v49, 7 }
 0x1a5   : > { %973 = vrot.lane.b32.xlu1 %v3495_v43, %s2961_s12  ;;  %v655_v59 = vadd.f32 %v2368_v56, %v3470_v25  ;;  %v649_v60 = vpop.f32.mrb[5].mxu0  ;;  %v928_v61 = vrot.slane %v3509_v52, 1  ;;  %v817_v10 = vadd.f32 %v3470_v25, %v816_v47  ;;  %v962_v21 = vsel %vm920_vm4, %v925_v46, 0.0 }
 0x1a6   : > { %v927_v0 = vrot.slane %v3513_v55, 1  ;;  %971 = vrot.lane.b32.xlu0 %v3504_v49, %s2961_s12  ;;  %v650_v1 = vadd.f32 %v3470_v25, %v649_v60  ;;  %v923_v3 = vsel %vm920_vm4, %v921_v58, %v922_v53  ;;  %v3544_v24 = vsel %vm859_vm5, %v863_v54, %v864_v51 }
 0x1a7   : > { %v3529_v6 = vmax.f32 %v655_v59, 0.0  ;;  %v828_v30 = vmax.f32 %v822_v8, 0.0  ;;  %v827_v33 = vmax.f32 %v817_v10, 0.0  ;;  %v867_v34 = vrot.slane %v3509_v52, 7 }
 0x1a8   : > { %v3533_v19 = vmax.f32 %v650_v1, 0.0  ;;  %v2371_v22 = vpop.f32.mrb[6].mxu0  ;;  %v3539_v23 = vsel %vm920_vm4, %v927_v0, %v928_v61  ;;  %v3560_v37 = vsel %vm859_vm5, %v4181_v4, %v861_v63  ;;  %v866_v38 = vrot.slane %v3513_v55, 7 }
 0x1a9   : > { %1047 = vrot.lane.b32.xlu1 %v962_v21, %s2962_s6  ;;  %v665_v26 = vadd.f32 %v2371_v22, %v3470_v25  ;;  %v659_v28 = vpop.f32.mrb[7].mxu0  ;;  %v931_v29 = vrot.slane %v3529_v6, 1  ;;  %v3555_v36 = vmul.f32 %v836_v62, %v828_v30  ;;  %v3570_v43 = vmul.f32 %v836_v62, %v827_v33 }
 0x1aa   : > { %v930_v31 = vrot.slane %v3533_v19, 1  ;;  %1045 = vrot.lane.b32.xlu0 %v926_v57, %s2962_s6  ;;  %v660_v32 = vadd.f32 %v3470_v25, %v659_v28  ;;  %v961_v46 = vsel %vm920_vm4, %v922_v53, 0.0  ;;  %v870_v48 = vrot.slane %v3529_v6, 7 }
 0x1ab   : > { %v3553_v35 = vmax.f32 %v665_v26, 0.0  ;;  %v4180_v50 = vrot.slane %v3533_v19, 7  ;;  %v949_v59 = vrot.slane %v3555_v36, 1  ;;  %v948_v53 = vrot.slane %v3570_v43, 1 }
 0x1ac   : > { %v3563_v40 = vmax.f32 %v660_v32, 0.0  ;;  %v2374_v41 = vpop.f32.mrb[8].mxu0  ;;  %v3568_v42 = vsel %vm920_vm4, %v930_v31, %v931_v29  ;;  %v3599_v1 = vsel %vm859_vm5, %v866_v38, %v867_v34  ;;  %v888_v34 = vrot.slane %v3555_v36, 7 }
 0x1ad   : > { %981 = vrot.lane.b32.xlu1 %v3509_v52, %s2961_s12  ;;  %v675_v44 = vadd.f32 %v2374_v41, %v3470_v25  ;;  %v669_v45 = vpop.f32.mrb[9].mxu0  ;;  %v934_v47 = vrot.slane %v3553_v35, 1  ;;  %v873_v57 = vrot.slane %v3553_v35, 7  ;;  %v3606_v26 = vsel %vm920_vm4, %v949_v59, 0.0 }
 0x1ae   : > { %v933_v51 = vrot.slane %v3563_v40, 1  ;;  %979 = vrot.lane.b32.xlu0 %v3513_v55, %s2961_s12  ;;  %v670_v56 = vadd.f32 %v3470_v25, %v669_v45  ;;  %v4179_v60 = vrot.slane %v3563_v40, 7  ;;  %v3613_v32 = vsel %vm920_vm4, %v948_v53, %v949_v59 }
 0x1af   : > { %v3584_v58 = vmax.f32 %v675_v44, 0.0  ;;  %v887_v41 = vrot.slane %v3570_v43, 7  ;;  %v3620_v44 = vsel %vm859_vm5, %v4180_v50, %v870_v48 }
 0x1b0   : > { %v3589_v62 = vmax.f32 %v670_v56, 0.0  ;;  %v2377_v63 = vpop.f32.mrb[10].mxu0  ;;  %v3594_v0 = vsel %vm920_vm4, %v933_v51, %v934_v47  ;;  %v3635_v56 = vsel %vm859_vm5, %v4179_v60, %v873_v57 }
 0x1b1   : > { %v876_v8 = vrot.slane %v3584_v58, 7  ;;  %1043 = vrot.lane.b32.xlu1 %v961_v46, %s2962_s6  ;;  %v685_v10 = vadd.f32 %v2377_v63, %v3470_v25  ;;  %v679_v21 = vpop.f32.mrb[11].mxu0  ;;  %v937_v22 = vrot.slane %v3584_v58, 1 }
 0x1b2   : > { %v4178_v28 = vrot.slane %v3589_v62, 7  ;;  %v936_v30 = vrot.slane %v3589_v62, 1  ;;  %1041 = vrot.lane.b32.xlu0 %v923_v3, %s2962_s6  ;;  %v680_v31 = vadd.f32 %v3470_v25, %v679_v21  ;;  %v963_v3 = vsel %vm920_vm4, %v928_v61, 0.0 }
 0x1b3   : > { %v719_v33 = vmax.f32 %v685_v10, 0.0 }
 0x1b4   : > { %v3622_v45 = vmax.f32 %v680_v31, 0.0  ;;  %v2380_v46 = vpop.f32.mrb[12].mxu0  ;;  %v3630_v51 = vsel %vm920_vm4, %v936_v30, %v937_v22  ;;  %v3642_v61 = vsel %vm859_vm5, %v4178_v28, %v876_v8  ;;  %v3651_v31 = vsel %vm859_vm5, %v887_v41, %v888_v34 }
 0x1b5   : > { %v879_v59 = vrot.slane %v719_v33, 7  ;;  %1051 = vrot.lane.b32.xlu1 %v963_v3, %s2962_s6  ;;  %v940_v48 = vrot.slane %v719_v33, 1  ;;  %v695_v53 = vadd.f32 %v2380_v46, %v3470_v25  ;;  %v689_v52 = vpop.f32.mrb[13].mxu0  ;;  %v3654_v3 = vsel %vm859_vm5, 0.0, %v887_v41 }
 0x1b6   : > { %v878_v63 = vrot.slane %v3622_v45, 7  ;;  %v939_v10 = vrot.slane %v3622_v45, 1  ;;  %1049 = vrot.lane.b32.xlu0 %v3539_v23, %s2962_s6  ;;  %v690_v57 = vadd.f32 %v3470_v25, %v689_v52 }
 0x1b7   : > { %v967_v21 = vsel %vm920_vm4, %v940_v48, 0.0  ;;  %v721_v30 = vmax.f32 %v695_v53, 0.0 }
 0x1b8   : > { %v3656_v8 = vmax.f32 %v690_v57, 0.0  ;;  %v941_v46 = vsel %vm920_vm4, %v939_v10, %v940_v48  ;;  %v2383_v28 = vpop.f32.mrb[14].mxu0  ;;  %v3662_v23 = vsel %vm859_vm5, %v878_v63, %v879_v59  ;;  %v1143_v59 = vld [vmem:[%s4242_s3] sm:$0xff]  ;;  %v1144_v10 = vld [vmem:[%s4242_s3 + $0x8] sm:$0xf] }
 0x1b9   : > { %1067 = vrot.lane.b32.xlu1 %v967_v21, %s2962_s6  ;;  %v882_v52 = vrot.slane %v721_v30, 7  ;;  %v705_v53 = vadd.f32 %v2383_v28, %v3470_v25  ;;  %v699_v34 = vpop.f32.mrb[15].mxu0  ;;  %v943_v60 = vrot.slane %v721_v30, 1  ;;  %v3676_v28 = vpack.c.bf16 %v1144_v10, %v1143_v59 }
 0x1ba   : > { %997 = vrot.lane.b32.xlu0 %v719_v33, %s2961_s12  ;;  %v881_v41 = vrot.slane %v3656_v8, 7  ;;  %v942_v57 = vrot.slane %v3656_v8, 1  ;;  %v700_v48 = vadd.f32 %v3470_v25, %v699_v34 }
 0x1bb   : > { %v723_v21 = vmax.f32 %v705_v53, 0.0  ;;  %2520 = vmatprep.subr.msk.bf16.mxu1 %vm3475_vm3, %v3676_v28 }
 0x1bc   : > { %v3678_v50 = vmax.f32 %v700_v48, 0.0  ;;  %v944_v33 = vsel %vm920_vm4, %v942_v57, %v943_v60  ;;  %v3684_v4 = vsel %vm859_vm5, %v881_v41, %v882_v52 }
 0x1bd   : > { %1065 = vrot.lane.b32.xlu1 %v941_v46, %s2962_s6  ;;  %v885_v25 = vrot.slane %v723_v21, 7  ;;  %v946_v34 = vrot.slane %v723_v21, 1  ;;  %v968_v46 = vsel %vm920_vm4, %v943_v60, 0.0  ;;  %v964_v60 = vsel %vm920_vm4, %v931_v29, 0.0 }
 0x1be   : > { %995 = vrot.lane.b32.xlu0 %v3622_v45, %s2961_s12  ;;  %v884_v53 = vrot.slane %v3678_v50, 7  ;;  %v945_v57 = vrot.slane %v3678_v50, 1 }
 0x1bf   : > { %v969_v59 = vsel %vm920_vm4, %v946_v34, 0.0 }
 0x1c0   : > { %v947_v48 = vsel %vm920_vm4, %v945_v57, %v946_v34  ;;  %v3698_v52 = vsel %vm859_vm5, %v884_v53, %v885_v25 }
 0x1c1   : > { %1001 = vrot.lane.b32.xlu1 %v721_v30, %s2961_s12  ;;  %v965_v30 = vsel %vm920_vm4, %v934_v47, 0.0 }
 0x1c2   : > { %999 = vrot.lane.b32.xlu0 %v3656_v8, %s2961_s12 }
 0x1c5   : > { %1071 = vrot.lane.b32.xlu1 %v968_v46, %s2962_s6 }
 0x1c6   : > { %1069 = vrot.lane.b32.xlu0 %v944_v33, %s2962_s6 }
 0x1c9   : > { %1005 = vrot.lane.b32.xlu1 %v723_v21, %s2961_s12 }
 0x1ca   : > { %1003 = vrot.lane.b32.xlu0 %v3678_v50, %s2961_s12 }
 0x1cd   : > { %1075 = vrot.lane.b32.xlu1 %v969_v59, %s2962_s6  ;;  %v2208_v59 = vld [vmem:[%s4242_s3 + $0x20] sm:$0xff] }
 0x1ce   : > { %1073 = vrot.lane.b32.xlu0 %v947_v48, %s2962_s6 }
 0x1d1   : > { %985 = vrot.lane.b32.xlu1 %v3529_v6, %s2961_s12  ;;  %v966_v6 = vsel %vm920_vm4, %v937_v22, 0.0 }
 0x1d2   : > { %983 = vrot.lane.b32.xlu0 %v3533_v19, %s2961_s12 }
 0x1d5   : > { %1055 = vrot.lane.b32.xlu1 %v964_v60, %s2962_s6 }
 0x1d6   : > { %1053 = vrot.lane.b32.xlu0 %v3568_v42, %s2962_s6 }
 0x1d9   : > { %989 = vrot.lane.b32.xlu1 %v3553_v35, %s2961_s12 }
 0x1da   : > { %987 = vrot.lane.b32.xlu0 %v3563_v40, %s2961_s12 }
 0x1dd   : > { %1059 = vrot.lane.b32.xlu1 %v965_v30, %s2962_s6  ;;  %v916_v30 = vsel %vm859_vm5, 0.0, %v878_v63  ;;  %v917_v63 = vsel %vm859_vm5, 0.0, %v881_v41  ;;  %v918_v41 = vsel %vm859_vm5, 0.0, %v884_v53 }
 0x1de   : > { %1057 = vrot.lane.b32.xlu0 %v3594_v0, %s2962_s6 }
 0x1e1   : > { %993 = vrot.lane.b32.xlu1 %v3584_v58, %s2961_s12 }
 0x1e2   : > { %991 = vrot.lane.b32.xlu0 %v3589_v62, %s2961_s12 }
 0x1e5   : > { %1063 = vrot.lane.b32.xlu1 %v966_v6, %s2962_s6 }
 0x1e6   : > { %1061 = vrot.lane.b32.xlu0 %v3630_v51, %s2962_s6 }
 0x1e9   : > { %1009 = vrot.lane.b32.xlu1 %v3555_v36, %s2961_s12  ;;  %v911_v36 = vsel %vm859_vm5, 0.0, %v863_v54 }
 0x1ea   : > { %1007 = vrot.lane.b32.xlu0 %v3570_v43, %s2961_s12  ;;  %s1965_s12 = scalar_lea.sflag [#allocation4], %s3356_s7 }
 0x1ed   : > { %1079 = vrot.lane.b32.xlu1 %v3606_v26, %s2962_s6 }
 0x1ee   : > { %1077 = vrot.lane.b32.xlu0 %v3613_v32, %s2962_s6 }
 0x213   : > { %v978_v29 = vpop.permute.xlu1 %977 }
 0x214   : > { %v976_v35 = vpop.permute.xlu0 %975  ;;  %v1105_v22 = vsel %vm1101_vm6, %v3544_v24, %v978_v29  ;;  %v912_v24 = vsel %vm859_vm5, 0.0, %v866_v38 }
 0x215   : > { %v1104_v43 = vsel %vm1101_vm6, %v911_v36, %v976_v35 }
 0x217   : > { %v3750_v42 = vpop.permute.xlu1 %973 }
 0x218   : > { %v3752_v47 = vpop.permute.xlu0 %971 }
 0x21b   : > { %v1048_v58 = vpop.permute.xlu1 %1047 }
 0x21c   : > { %v1046_v0 = vpop.permute.xlu0 %1045  ;;  %v3764_v32 = vsel %vm1122_vm7, %v1105_v22, %v1048_v58 }
 0x21d   : > { %v3761_v26 = vsel %vm1122_vm7, %v1104_v43, %v1046_v0 }
 0x21e   : > { %2398 = vmatprep.mubr.msk.f32.mxu0 %vm1148_vm8, %v3761_v26 }
 0x21f   : > { %v982_v39 = vpop.permute.xlu1 %981  ;;  %2399 = vmatmul.mubr.msk.f32.vlgmr.msra.gmra.mrb[16].mxu0 %vm1148_vm8, %v3764_v32 }
 0x220   : > { %v980_v54 = vpop.permute.xlu0 %979  ;;  %v1107_v34 = vsel %vm1101_vm6, %v3599_v1, %v982_v39  ;;  %v2209_v1 = vld [vmem:[%s4242_s3 + $0x28] sm:$0xf] }
 0x221   : > { %v1106_v33 = vsel %vm1101_vm6, %v912_v24, %v980_v54  ;;  %v2524_v36 = vpack.c.bf16 %v2209_v1, %v2208_v59  ;;  %v1103_v59 = vsel %vm1101_vm6, %v3560_v37, %v3750_v42  ;;  %v4247_v1 = vrot.slane %v3533_v19, 7 }
 0x223   : > { %v1044_v51 = vpop.permute.xlu1 %1043 }
 0x224   : > { %v1042_v10 = vpop.permute.xlu0 %1041 }
 0x227   : > { %v1052_v21 = vpop.permute.xlu1 %1051 }
 0x228   : > { %v1050_v25 = vpop.permute.xlu0 %1049  ;;  %v3780_v48 = vsel %vm1122_vm7, %v1107_v34, %v1052_v21 }
 0x229   : > { %v3777_v57 = vsel %vm1122_vm7, %v1106_v33, %v1050_v25  ;;  %v4246_v25 = vrot.slane %v3504_v49, 7 }
 0x22a   : > { %2401 = vmatprep.mubr.msk.f32.mxu0 %vm1148_vm8, %v3777_v57 }
 0x22b   : > { %v1068_v46 = vpop.permute.xlu1 %1067  ;;  %2402 = vmatmul.mubr.msk.f32.gmra.mrb[18].mxu0 %vm1148_vm8, %v3780_v48  ;;  %v910_v34 = vsel %vm859_vm5, 0.0, %v4246_v25 }
 0x22c   : > { %v998_v55 = vpop.permute.xlu0 %997 }
 0x22d   : > { %v1115_v60 = vsel %vm1101_vm6, %v3662_v23, %v998_v55 }
 0x22e   : > { %v3802_v58 = vsel %vm1122_vm7, %v1115_v60, %v1068_v46  ;;  %v913_v60 = vsel %vm859_vm5, 0.0, %v4247_v1 }
 0x22f   : > { %v1066_v38 = vpop.permute.xlu1 %1065 }
 0x230   : > { %v996_v6 = vpop.permute.xlu0 %995 }
 0x231   : > { %v1114_v29 = vsel %vm1101_vm6, %v916_v30, %v996_v6 }
 0x232   : > { %v3799_v35 = vsel %vm1122_vm7, %v1114_v29, %v1066_v38  ;;  %v1102_v38 = vsel %vm1101_vm6, %v910_v34, %v3752_v47  ;;  %v1124_v47 = vsel %vm1122_vm7, %v1103_v59, %v1044_v51 }
 0x233   : > { %v1002_v43 = vpop.permute.xlu1 %1001  ;;  %2413 = vmatprep.mubr.msk.f32.mxu1 %vm1148_vm8, %v3799_v35  ;;  %v1123_v53 = vsel %vm1122_vm7, %v1102_v38, %v1042_v10 }
 0x234   : > { %2414 = vmatmul.mubr.msk.f32.vlgmr.msra.gmra.mrb[4].mxu1 %vm1148_vm8, %v3802_v58  ;;  %v1000_v45 = vpop.permute.xlu0 %999  ;;  %v1117_v39 = vsel %vm1101_vm6, %v3684_v4, %v1002_v43 }
 0x235   : > { %2523 = vmatpush3.bf16.msk.msra.mxu1 %vm3475_vm3, %v3676_v28  ;;  %v1116_v0 = vsel %vm1101_vm6, %v917_v63, %v1000_v45 }
 0x236   : > { %2526 = vmatprep.subr.msk.bf16.mxu1 %vm3475_vm3, %v2524_v36 }
 0x237   : > { %v1072_v23 = vpop.permute.xlu1 %1071 }
 0x238   : > { %v1070_v22 = vpop.permute.xlu0 %1069  ;;  %v3823_v24 = vsel %vm1122_vm7, %v1117_v39, %v1072_v23 }
 0x239   : > { %v3820_v54 = vsel %vm1122_vm7, %v1116_v0, %v1070_v22  ;;  %v4249_v0 = vrot.slane %v3589_v62, 7 }
 0x23a   : > { %2416 = vmatprep.mubr.msk.f32.mxu1 %vm1148_vm8, %v3820_v54 }
 0x23b   : > { %v1006_v28 = vpop.permute.xlu1 %1005  ;;  %2417 = vmatmul.mubr.msk.f32.gmra.mrb[6].mxu1 %vm1148_vm8, %v3823_v24  ;;  %v915_v22 = vsel %vm859_vm5, 0.0, %v4249_v0 }
 0x23c   : > { %v1004_v8 = vpop.permute.xlu0 %1003  ;;  %v1119_v46 = vsel %vm1101_vm6, %v3698_v52, %v1006_v28 }
 0x23d   : > { %v1118_v4 = vsel %vm1101_vm6, %v918_v41, %v1004_v8 }
 0x23f   : > { %v1076_v21 = vpop.permute.xlu1 %1075 }
 0x240   : > { %v1074_v33 = vpop.permute.xlu0 %1073  ;;  %v3844_v50 = vsel %vm1122_vm7, %v1119_v46, %v1076_v21 }
 0x241   : > { %v3839_v55 = vsel %vm1122_vm7, %v1118_v4, %v1074_v33 }
 0x242   : > { %2419 = vmatprep.mubr.msk.f32.mxu1 %vm1148_vm8, %v3839_v55 }
 0x243   : > { %v986_v49 = vpop.permute.xlu1 %985  ;;  %2420 = vmatmul.mubr.msk.f32.gmra.mrb[8].mxu1 %vm1148_vm8, %v3844_v50 }
 0x244   : > { %2426 = vmatprep.mubr.msk.f32.mxu1 %vm1148_vm8, %v1123_v53  ;;  %v984_v52 = vpop.permute.xlu0 %983  ;;  %v1109_v37 = vsel %vm1101_vm6, %v3620_v44, %v986_v49 }
 0x245   : > { %v1108_v10 = vsel %vm1101_vm6, %v913_v60, %v984_v52  ;;  %v3949_v52 = vld [vmem:[%s4251_s23] ss:$0 sm:$0xff]  ;;  %s2799_s23 = scalar_lea.vmem %s4055_s5, 2048 }
 0x246   : > { %p2800_p7 = scmp.ne.s32.totalorder %s4055_s5, %s2799_s23 }
 0x247   : > { %v1056_v30 = vpop.permute.xlu1 %1055  ;;  %2427 = vmatmul.mubr.msk.f32.vlgmr.msra.gmra.mrb[10].mxu1 %vm1148_vm8, %v1124_v47 }
 0x248   : > { %2529 = vmatpush3.bf16.msk.msra.mxu1 %vm3475_vm3, %v2524_v36  ;;  %v1054_v6 = vpop.permute.xlu0 %1053  ;;  %2429 = vmatprep.mubr.msk.f32.mxu1 %vm1148_vm8, %v3761_v26  ;;  %v1130_v19 = vsel %vm1122_vm7, %v1109_v37, %v1056_v30  ;;  %v4248_v26 = vrot.slane %v3563_v40, 7  ;;  %p2801_p4 = pnand %p2800_p7, %p4255_p6 }
 0x249   : > { %v1129_v42 = vsel %vm1122_vm7, %v1108_v10, %v1054_v6 }
 0x24a   : > { %2404 = vmatprep.mubr.msk.f32.mxu0 %vm1148_vm8, %v1129_v42  ;;  %v914_v44 = vsel %vm859_vm5, 0.0, %v4248_v26  ;;  %p2802_p0 = pneg %p2801_p4 }
 0x24b   : > { %v990_v51 = vpop.permute.xlu1 %989  ;;  %2405 = vmatmul.mubr.msk.f32.gmra.mrb[20].mxu0 %vm1148_vm8, %v1130_v19  ;;  %2430 = vmatmul.mubr.msk.f32.gmra.mrb[12].mxu1 %vm1148_vm8, %v3764_v32 }
 0x24c   : > { %v988_v27 = vpop.permute.xlu0 %987  ;;  %2432 = vmatprep.mubr.msk.f32.mxu1 %vm1148_vm8, %v3777_v57  ;;  %v1111_v32 = vsel %vm1101_vm6, %v3635_v56, %v990_v51 }
 0x24d   : > { %v1110_v36 = vsel %vm1101_vm6, %v914_v44, %v988_v27 }
 0x24f   : > { %v1060_v29 = vpop.permute.xlu1 %1059  ;;  %2433 = vmatmul.mubr.msk.f32.gmra.mrb[14].mxu1 %vm1148_vm8, %v3780_v48 }
 0x250   : > { %v1058_v43 = vpop.permute.xlu0 %1057  ;;  %2435 = vmatprep.mubr.msk.f32.mxu1 %vm1148_vm8, %v1129_v42  ;;  %v1132_v63 = vsel %vm1122_vm7, %v1111_v32, %v1060_v29 }
 0x251   : > { %v1131_v45 = vsel %vm1122_vm7, %v1110_v36, %v1058_v43 }
 0x252   : > { %2407 = vmatprep.mubr.msk.f32.mxu0 %vm1148_vm8, %v1131_v45 }
 0x253   : > { %v994_v40 = vpop.permute.xlu1 %993  ;;  %2408 = vmatmul.mubr.msk.f32.gmra.mrb[22].mxu0 %vm1148_vm8, %v1132_v63  ;;  %2436 = vmatmul.mubr.msk.f32.gmra.mrb[16].mxu1 %vm1148_vm8, %v1130_v19 }
 0x254   : > { %v992_v23 = vpop.permute.xlu0 %991  ;;  %2438 = vmatprep.mubr.msk.f32.mxu1 %vm1148_vm8, %v1131_v45  ;;  %v1113_v8 = vsel %vm1101_vm6, %v3642_v61, %v994_v40 }
 0x255   : > { %v1112_v56 = vsel %vm1101_vm6, %v915_v22, %v992_v23 }
 0x257   : > { %v1064_v39 = vpop.permute.xlu1 %1063  ;;  %2439 = vmatmul.mubr.msk.f32.gmra.mrb[18].mxu1 %vm1148_vm8, %v1132_v63 }
 0x258   : > { %v1062_v28 = vpop.permute.xlu0 %1061  ;;  %v1134_v21 = vsel %vm1122_vm7, %v1113_v8, %v1064_v39 }
 0x259   : > { %v1133_v41 = vsel %vm1122_vm7, %v1112_v56, %v1062_v28 }
 0x25a   : > { %2410 = vmatprep.mubr.msk.f32.mxu0 %vm1148_vm8, %v1133_v41  ;;  %2441 = vmatprep.mubr.msk.f32.mxu1 %vm1148_vm8, %v1133_v41 }
 0x25b   : > { %2411 = vmatmul.mubr.msk.f32.gmra.mrb[24].mxu0 %vm1148_vm8, %v1134_v21  ;;  %2442 = vmatmul.mubr.msk.f32.gmra.mrb[4].mxu1 %vm1148_vm8, %v1134_v21  ;;  %v1010_v61 = vpop.permute.xlu1 %1009 }
 0x25c   : > { %2444 = vmatprep.mubr.msk.f32.mxu1 %vm1148_vm8, %v3799_v35  ;;  %v1008_v62 = vpop.permute.xlu0 %1007 }
 0x25f   : > { %2445 = vmatmul.mubr.msk.f32.gmra.mrb[6].mxu1 %vm1148_vm8, %v3802_v58  ;;  %v1080_v4 = vpop.permute.xlu1 %1079 }
 0x260   : > { %2447 = vmatprep.mubr.msk.f32.mxu1 %vm1148_vm8, %v3820_v54 }
 0x263   : > { %2448 = vmatmul.mubr.msk.f32.gmra.mrb[8].mxu1 %vm1148_vm8, %v3823_v24 }
 0x264   : > { %2454 = vmatprep.mubr.msk.f32.mxu1 %vm1148_vm8, %v3777_v57  ;;  %v1078_v57 = vpop.permute.xlu0 %1077 }
 0x267   : > { %2455 = vmatmul.mubr.msk.f32.vlgmr.msra.gmra.mrb[10].mxu1 %vm1148_vm8, %v3780_v48  ;;  %v1120_v48 = vsel %vm1101_vm6, %v3654_v3, %v1008_v62 }
 0x268   : > { %2457 = vmatprep.mubr.msk.f32.mxu1 %vm1148_vm8, %v1129_v42 }
 0x26b   : > { %2458 = vmatmul.mubr.msk.f32.gmra.mrb[12].mxu1 %vm1148_vm8, %v1130_v19 }
 0x26c   : > { %2460 = vmatprep.mubr.msk.f32.mxu1 %vm1148_vm8, %v1131_v45 }
 0x26f   : > { %2461 = vmatmul.mubr.msk.f32.gmra.mrb[14].mxu1 %vm1148_vm8, %v1132_v63 }
 0x270   : > { %2463 = vmatprep.mubr.msk.f32.mxu1 %vm1148_vm8, %v1133_v41 }
 0x273   : > { %2464 = vmatmul.mubr.msk.f32.gmra.mrb[16].mxu1 %vm1148_vm8, %v1134_v21 }
 0x274   : > { %2466 = vmatprep.mubr.msk.f32.mxu1 %vm1148_vm8, %v3799_v35  ;;  %v1141_v35 = vsel %vm1122_vm7, %v1120_v48, %v1078_v57 }
 0x277   : > { %2467 = vmatmul.mubr.msk.f32.gmra.mrb[18].mxu1 %vm1148_vm8, %v3802_v58  ;;  %v1121_v58 = vsel %vm1101_vm6, %v3651_v31, %v1010_v61 }
 0x278   : > { %2469 = vmatprep.mubr.msk.f32.mxu1 %vm1148_vm8, %v3820_v54  ;;  %v1142_v54 = vsel %vm1122_vm7, %v1121_v58, %v1080_v4 }
 0x27b   : > { %2470 = vmatmul.mubr.msk.f32.gmra.mrb[4].mxu1 %vm1148_vm8, %v3823_v24  ;;  %v1712_v24 = vld [vmem:[%s4250_s4] sm:$0xf]  ;;  %s4254_s4 = sld [smem:[#allocation34_spill]] }
 0x27c   : > { %2472 = vmatprep.mubr.msk.f32.mxu1 %vm1148_vm8, %v3839_v55  ;;  %2478 = vmatprep.subr.msk.mxu0 %vm1197_vm1, %v1712_v24 }
 0x27d   : > { %2479 = vmatpush3.msk.msra.mxu0 %vm1197_vm1, %v1712_v24 }
 0x27f   : > { %2473 = vmatmul.mubr.msk.f32.gmra.mrb[6].mxu1 %vm1148_vm8, %v3844_v50 }
 0x280   : > { %2475 = vmatprep.mubr.msk.f32.mxu1 %vm1148_vm8, %v1141_v35 }
 0x281   : > { %s4060_s28 = scalar_lea.hbm %s4254_s4, %s2250_s29 }
 0x283   : > { %2476 = vmatmul.mubr.msk.f32.gmra.mrb[8].mxu1 %vm1148_vm8, %v1142_v54 }
 0x2f2   : > { %v2400_v3 = vpop.f32.mrb[16].mxu0 }
 0x2f3   : > { %v1267_v33 = vpop.f32.mrb[17].mxu0 }
 0x2fe   : > { %v2403_v25 = vpop.f32.mrb[18].mxu0 }
 0x2ff   : > { %v1277_v34 = vpop.f32.mrb[19].mxu0 }
 0x31e   : > { %v2406_v46 = vpop.f32.mrb[20].mxu0 }
 0x31f   : > { %v1287_v55 = vpop.f32.mrb[21].mxu0 }
 0x326   : > { %v2409_v38 = vpop.f32.mrb[22].mxu0 }
 0x327   : > { %v1297_v31 = vpop.f32.mrb[23].mxu0 }
 0x32e   : > { %v2412_v50 = vpop.f32.mrb[24].mxu0 }
 0x32f   : > { %v1307_v53 = vpop.f32.mrb[25].mxu0 }
 0x33a   : > { %v2456_v49 = vpop.f32.mrb[10].mxu1 }
 0x33b   : > { %v2532_v59 = vadd.f32 %v2456_v49, %v2400_v3  ;;  %v1578_v47 = vpop.f32.mrb[11].mxu1 }
 0x33c   : > { %v2533_v1 = vadd.f32 %v1578_v47, %v1267_v33 }
 0x33d   : > { %v1681_v60 = vadd.f32 %v2532_v59, %v3949_v52 }
 0x33e   : > { %v1680_v30 = vadd.f32 %v2533_v1, %v3949_v52  ;;  %v2459_v10 = vpop.f32.mrb[12].mxu1 }
 0x33f   : > { %v2534_v6 = vadd.f32 %v2459_v10, %v2403_v25  ;;  %v1588_v37 = vpop.f32.mrb[13].mxu1  ;;  %v1697_v51 = vmax.f32 %v1681_v60, 0.0 }
 0x340   : > { %v1696_v42 = vmax.f32 %v1680_v30, 0.0  ;;  %v2535_v19 = vadd.f32 %v1588_v37, %v1277_v34  ;;  %v3986_v37 = vld [vmem:[%s4252_s18] ss:$0 sm:$0xff] }
 0x341   : > { %v1683_v27 = vadd.f32 %v2534_v6, %v3949_v52 }
 0x342   : > { %v1682_v26 = vadd.f32 %v2535_v19, %v3949_v52  ;;  %v2462_v44 = vpop.f32.mrb[14].mxu1  ;;  %2480 = vmatprep.mubr.msk.f32.mxu0 %vm1101_vm6, %v1696_v42 }
 0x343   : > { %v2536_v29 = vadd.f32 %v2462_v44, %v2406_v46  ;;  %v1598_v36 = vpop.f32.mrb[15].mxu1  ;;  %2481 = vmatmul.mubr.msk.f32.vlgmr.msra.gmra.mrb[26].mxu0 %vm1101_vm6, %v1697_v51  ;;  %v1699_v45 = vmax.f32 %v1683_v27, 0.0 }
 0x344   : > { %v1698_v43 = vmax.f32 %v1682_v26, 0.0  ;;  %v2537_v32 = vadd.f32 %v1598_v36, %v1287_v55 }
 0x345   : > { %v1685_v63 = vadd.f32 %v2536_v29, %v3949_v52 }
 0x346   : > { %v1684_v40 = vadd.f32 %v2537_v32, %v3949_v52  ;;  %v2465_v23 = vpop.f32.mrb[16].mxu1  ;;  %2483 = vmatprep.mubr.msk.f32.mxu0 %vm1101_vm6, %v1698_v43 }
 0x347   : > { %v2538_v0 = vadd.f32 %v2465_v23, %v2409_v38  ;;  %v1608_v22 = vpop.f32.mrb[17].mxu1  ;;  %2484 = vmatmul.mubr.msk.f32.gmra.mrb[28].mxu0 %vm1101_vm6, %v1699_v45  ;;  %v1701_v28 = vmax.f32 %v1685_v63, 0.0 }
 0x348   : > { %v1700_v39 = vmax.f32 %v1684_v40, 0.0  ;;  %v2539_v56 = vadd.f32 %v1608_v22, %v1297_v31 }
 0x349   : > { %v1687_v8 = vadd.f32 %v2538_v0, %v3949_v52 }
 0x34a   : > { %v1686_v41 = vadd.f32 %v2539_v56, %v3949_v52  ;;  %v2468_v21 = vpop.f32.mrb[18].mxu1  ;;  %2486 = vmatprep.mubr.msk.f32.mxu0 %vm1101_vm6, %v1700_v39 }
 0x34b   : > { %v2540_v62 = vadd.f32 %v2468_v21, %v2412_v50  ;;  %v1618_v61 = vpop.f32.mrb[19].mxu1  ;;  %2487 = vmatmul.mubr.msk.f32.gmra.mrb[30].mxu0 %vm1101_vm6, %v1701_v28  ;;  %v1703_v4 = vmax.f32 %v1687_v8, 0.0 }
 0x34c   : > { %v1702_v57 = vmax.f32 %v1686_v41, 0.0  ;;  %v2541_v48 = vadd.f32 %v1618_v61, %v1307_v53 }
 0x34d   : > { %v1689_v35 = vadd.f32 %v2540_v62, %v3949_v52 }
 0x34e   : > { %v1688_v58 = vadd.f32 %v2541_v48, %v3949_v52  ;;  %v2471_v54 = vpop.f32.mrb[4].mxu1  ;;  %2489 = vmatprep.mubr.msk.f32.mxu0 %vm1101_vm6, %v1702_v57 }
 0x34f   : > { %v1628_v24 = vpop.f32.mrb[5].mxu1  ;;  %2490 = vmatmul.mubr.msk.f32.gmra.mrb[32].mxu0 %vm1101_vm6, %v1703_v4  ;;  %v1705_v25 = vmax.f32 %v1689_v35, 0.0  ;;  %v1691_v34 = vadd.f32 %v2471_v54, %v3949_v52 }
 0x350   : > { %v1704_v3 = vmax.f32 %v1688_v58, 0.0  ;;  %v1690_v33 = vadd.f32 %v3949_v52, %v1628_v24 }
 0x351   : > { %v1707_v50 = vmax.f32 %v1691_v34, 0.0 }
 0x352   : > { %v1706_v46 = vmax.f32 %v1690_v33, 0.0  ;;  %v2474_v55 = vpop.f32.mrb[6].mxu1  ;;  %2492 = vmatprep.mubr.msk.f32.mxu0 %vm1101_vm6, %v1704_v3 }
 0x353   : > { %v1638_v38 = vpop.f32.mrb[7].mxu1  ;;  %2493 = vmatmul.mubr.msk.f32.gmra.mrb[34].mxu0 %vm1101_vm6, %v1705_v25  ;;  %v1693_v53 = vadd.f32 %v2474_v55, %v3949_v52 }
 0x354   : > { %v1692_v31 = vadd.f32 %v3949_v52, %v1638_v38  ;;  %2495 = vmatprep.mubr.msk.f32.mxu0 %vm1101_vm6, %v1706_v46 }
 0x355   : > { %v1709_v60 = vmax.f32 %v1693_v53, 0.0 }
 0x356   : > { %v1708_v49 = vmax.f32 %v1692_v31, 0.0  ;;  %v2477_v59 = vpop.f32.mrb[8].mxu1 }
 0x357   : > { %v1648_v47 = vpop.f32.mrb[9].mxu1  ;;  %2496 = vmatmul.mubr.msk.f32.gmra.mrb[36].mxu0 %vm1101_vm6, %v1707_v50  ;;  %v1695_v30 = vadd.f32 %v2477_v59, %v3949_v52 }
 0x358   : > { %v1694_v1 = vadd.f32 %v3949_v52, %v1648_v47  ;;  %2498 = vmatprep.mubr.msk.f32.mxu0 %vm1101_vm6, %v1708_v49 }
 0x359   : > { %v1711_v6 = vmax.f32 %v1695_v30, 0.0 }
 0x35a   : > { %v1710_v10 = vmax.f32 %v1694_v1, 0.0 }
 0x35b   : > { %2499 = vmatmul.mubr.msk.f32.gmra.mrb[38].mxu0 %vm1101_vm6, %v1709_v60 }
 0x35c   : > { %2501 = vmatprep.mubr.msk.f32.mxu0 %vm1101_vm6, %v1710_v10 }
 0x35f   : > { %2502 = vmatmul.mubr.msk.f32.gmra.mrb[40].mxu0 %vm1101_vm6, %v1711_v6 }
 0x416   : > { %v2482_v42 = vpop.f32.mrb[26].mxu0 }
 0x417   : > { %v1843_v19 = vadd.f32 %v2482_v42, %v3986_v37  ;;  %v1837_v51 = vpop.f32.mrb[27].mxu0  ;;  %v2708_v42 = vld [vmem:[%s3362_s25 + $0x70] sm:$0xff] }
 0x418   : > { %v1838_v52 = vadd.f32 %v3986_v37, %v1837_v51 }
 0x419   : > { %v1917_v27 = vadd.f32 %v1843_v19, %v3392_v5 }
 0x41a   : > { %v1916_v26 = vadd.f32 %v1838_v52, %v3386_v2  ;;  %v2485_v44 = vpop.f32.mrb[28].mxu0 }
 0x41b   : > { %v1933_v29 = vmax.f32 %v1917_v27, 0.0  ;;  %v1853_v36 = vadd.f32 %v2485_v44, %v3986_v37  ;;  %v1847_v43 = vpop.f32.mrb[29].mxu0 }
 0x41c   : > { %v1932_v32 = vmax.f32 %v1916_v26, 0.0  ;;  %v1848_v45 = vadd.f32 %v3986_v37, %v1847_v43 }
 0x41d   : > { %1949 = vst.msk [vmem:[%s3996_s20 + $0x8] sm:$0xff] %vm514_vm0, %v1933_v29  ;;  %v1919_v5 = vadd.f32 %v1853_v36, %v3403_v9 }
 0x41e   : > { %1948 = vst.msk [vmem:[%s3996_s20] sm:$0xff] %vm514_vm0, %v1932_v32  ;;  %v1918_v2 = vadd.f32 %v1848_v45, %v3395_v7  ;;  %v2488_v63 = vpop.f32.mrb[30].mxu0 }
 0x41f   : > { %v1935_v40 = vmax.f32 %v1919_v5, 0.0  ;;  %v1863_v23 = vadd.f32 %v2488_v63, %v3986_v37  ;;  %v1857_v0 = vpop.f32.mrb[31].mxu0 }
 0x420   : > { %v1934_v22 = vmax.f32 %v1918_v2, 0.0  ;;  %v1858_v39 = vadd.f32 %v3986_v37, %v1857_v0 }
 0x421   : > { %1951 = vst.msk [vmem:[%s3996_s20 + $0x18] sm:$0xff] %vm514_vm0, %v1935_v40  ;;  %v1921_v56 = vadd.f32 %v1863_v23, %v3415_v12 }
 0x422   : > { %1950 = vst.msk [vmem:[%s3996_s20 + $0x10] sm:$0xff] %vm514_vm0, %v1934_v22  ;;  %v1920_v9 = vadd.f32 %v1858_v39, %v3407_v11  ;;  %v2491_v28 = vpop.f32.mrb[32].mxu0 }
 0x423   : > { %v1937_v7 = vmax.f32 %v1921_v56, 0.0  ;;  %v1873_v8 = vadd.f32 %v2491_v28, %v3986_v37  ;;  %v1867_v41 = vpop.f32.mrb[33].mxu0 }
 0x424   : > { %v1936_v21 = vmax.f32 %v1920_v9, 0.0  ;;  %v1868_v62 = vadd.f32 %v3986_v37, %v1867_v41 }
 0x425   : > { %1953 = vst.msk [vmem:[%s3996_s20 + $0x28] sm:$0xff] %vm514_vm0, %v1937_v7  ;;  %v1923_v61 = vadd.f32 %v1873_v8, %v3425_v14 }
 0x426   : > { %1952 = vst.msk [vmem:[%s3996_s20 + $0x20] sm:$0xff] %vm514_vm0, %v1936_v21  ;;  %v1922_v12 = vadd.f32 %v1868_v62, %v3418_v13  ;;  %v2494_v57 = vpop.f32.mrb[34].mxu0 }
 0x427   : > { %v1939_v11 = vmax.f32 %v1923_v61, 0.0  ;;  %v1883_v48 = vadd.f32 %v2494_v57, %v3986_v37  ;;  %v1877_v4 = vpop.f32.mrb[35].mxu0 }
 0x428   : > { %v1938_v35 = vmax.f32 %v1922_v12, 0.0  ;;  %v1878_v58 = vadd.f32 %v3986_v37, %v1877_v4 }
 0x429   : > { %1955 = vst.msk [vmem:[%s3996_s20 + $0x38] sm:$0xff] %vm514_vm0, %v1939_v11  ;;  %v1925_v54 = vadd.f32 %v1883_v48, %v3435_v16 }
 0x42a   : > { %1954 = vst.msk [vmem:[%s3996_s20 + $0x30] sm:$0xff] %vm514_vm0, %v1938_v35  ;;  %v1924_v14 = vadd.f32 %v1878_v58, %v3428_v15  ;;  %v2497_v13 = vpop.f32.mrb[36].mxu0 }
 0x42b   : > { %v1941_v24 = vmax.f32 %v1925_v54, 0.0  ;;  %v1893_v3 = vadd.f32 %v2497_v13, %v3986_v37  ;;  %v1887_v33 = vpop.f32.mrb[37].mxu0 }
 0x42c   : > { %v1940_v25 = vmax.f32 %v1924_v14, 0.0  ;;  %v1888_v34 = vadd.f32 %v3986_v37, %v1887_v33 }
 0x42d   : > { %1957 = vst.msk [vmem:[%s3996_s20 + $0x48] sm:$0xff] %vm514_vm0, %v1941_v24  ;;  %v1927_v16 = vadd.f32 %v1893_v3, %v3445_v18 }
 0x42e   : > { %1956 = vst.msk [vmem:[%s3996_s20 + $0x40] sm:$0xff] %vm514_vm0, %v1940_v25  ;;  %v1926_v15 = vadd.f32 %v1888_v34, %v3438_v17  ;;  %v2500_v46 = vpop.f32.mrb[38].mxu0  ;;  %v2706_v17 = vld [vmem:[%s3362_s25 + $0x60] sm:$0xff] }
 0x42f   : > { %v1943_v55 = vmax.f32 %v1927_v16, 0.0  ;;  %v1903_v38 = vadd.f32 %v2500_v46, %v3986_v37  ;;  %v1897_v31 = vpop.f32.mrb[39].mxu0 }
 0x430   : > { %v1942_v50 = vmax.f32 %v1926_v15, 0.0  ;;  %v1898_v53 = vadd.f32 %v3986_v37, %v1897_v31 }
 0x431   : > { %1959 = vst.msk [vmem:[%s3996_s20 + $0x58] sm:$0xff] %vm514_vm0, %v1943_v55  ;;  %v1929_v18 = vadd.f32 %v1903_v38, %v3452_v20  ;;  %v2707_v20 = vld [vmem:[%s3362_s25 + $0x78] sm:$0xff]  ;;  %s2963_s25 = smov [#allocation8]  }
 0x432   : > { %1958 = vst.msk [vmem:[%s3996_s20 + $0x50] sm:$0xff] %vm514_vm0, %v1942_v50  ;;  %v1928_v49 = vadd.f32 %v2706_v17, %v1898_v53  ;;  %v2503_v59 = vpop.f32.mrb[40].mxu0  ;;  %s2803_s21 = sshll.u32 %s2963_s25, 4  ;;  %s2804_s21 = int_to_ptr.vmem [resolvable:$false] %s2803_s21 }
 0x433   : > { %v1945_v47 = vmax.f32 %v1929_v18, 0.0  ;;  %v1913_v1 = vadd.f32 %v2503_v59, %v3986_v37  ;;  %v1907_v60 = vpop.f32.mrb[41].mxu0  ;;  %s2805_s30 = scalar_lea.vmem %s2804_s21, 4096  ;;  %p2806_p12 = scmp.lt.s32.totalorder %s4055_s5, %s2804_s21 }
 0x434   : > { %v1944_v30 = vmax.f32 %v1928_v49, 0.0  ;;  %v1908_v10 = vadd.f32 %v3986_v37, %v1907_v60  ;;  %p2807_p11 = scmp.lt.s32.totalorder %s2805_s30, %s2799_s23 }
 0x435   : > { %1961 = vst.msk [vmem:[%s3996_s20 + $0x68] sm:$0xff] %vm514_vm0, %v1945_v47  ;;  %v1931_v6 = vadd.f32 %v2707_v20, %v1913_v1 }
 0x436   : > { %1960 = vst.msk [vmem:[%s3996_s20 + $0x60] sm:$0xff] %vm514_vm0, %v1944_v30  ;;  %v1930_v19 = vadd.f32 %v2708_v42, %v1908_v10  ;;  %p2808_p2 = por %p2807_p11, %p2806_p12 }
 0x437   : > { %v1947_v51 = vmax.f32 %v1931_v6, 0.0 }
 0x438   : > { %v1946_v52 = vmax.f32 %v1930_v19, 0.0  ;;  %p2809_p1 = pnand %p2808_p2, %p2802_p0 }
 0x439   : > { %1963 = vst.msk [vmem:[%s3996_s20 + $0x78] sm:$0xff] %vm514_vm0, %v1947_v51 }
 0x43a   : > { %1962 = vst.msk [vmem:[%s3996_s20 + $0x70] sm:$0xff] %vm514_vm0, %v1946_v52 }
 0x43b   : > { %2812 = shalt.err (!%p2809_p1)
}
 0x43c   : > { %s2813_s18 = scalar_lea.hbm %s4060_s28, 2048  ;;  %s2817_s17 = scalar_lea.hbm %s4254_s4, 8192 }
 0x43d   : > { %p2814_p5 = scmp.ne.s32.totalorder %s4060_s28, %s2813_s18  ;;  %p2818_p10 = scmp.lt.u32.totalorder %s4060_s28, %s4254_s4 }
 0x43e   : > { %p2819_p3 = scmp.lt.u32.totalorder %s2817_s17, %s2813_s18  ;;  %p2821_p7 = scmp.lt.u32.totalorder %s2813_s18, %s4060_s28 }
 0x43f   : > { %p2815_p8 = pnand %p2814_p5, %p4255_p6 }
 0x440   : > { %p2820_p9 = por %p2819_p3, %p2818_p10 }
 0x441   : > { %p2816_p13 = pneg %p2815_p8 }
 0x442   : > { %p2822_p4 = por %p2821_p7, %p2820_p9 }
 0x444   : > { %p2823_p0 = pnand %p2822_p4, %p2816_p13 }
 0x446   : > { %2826 = shalt.err (!%p2823_p0)
}
 0x447   : > { %s2964_s29 = smov 128  }
 0x448   : > { %2570 = dma.vmem_to_hbm [thread:$0]  (%p4255_p6), %s4055_s5, 2048, %s4060_s28, %s1965_s12, %s2964_s29, %s2964_s29, %s2962_s6  }
 0x449 PF: > { %p2587_p12 = scmp.ge.s32.totalorder %s2953_s22, 2  ;;  %s1996_s13 = sand.u32 1, %s2925_s15  }
 0x44a   : > { %p4256_p11 = scmp.ne.s32.totalorder %s4217_s27, 0  ;;  %s1997_s26 = scalar_lea.sflag [#allocation4], %s1996_s13 }
 0x44c   : > { %p2583_p2 = pnand %p2587_p12, %p4256_p11 }
 0x44e   : > { %2896 = dma.done.wait (!%p2583_p2), %s1997_s26, 2048  }
 0x44f   : > { %2898 = vsyncadd (!%p2583_p2), %s1997_s26, 4294965248  ;;  %s28_s22 = sadd.s32 1, %s2953_s22   ;;  %s4258_s12 = sld [smem:[#allocation13_spill]] }
 0x450   : > { %p4096_p1 = scmp.ge.s32.totalorder %s28_s22, 6   ;;  %s4259_s7 = sld [smem:[#allocation23_spill]] }
 0x451   : > { %s4260_s6 = sld [smem:[#allocation14_spill]]  ;;  %s4261_s17 = sld [smem:[#allocation24_spill]] }
 0x452   : > { %s4262_s18 = sld [smem:[#allocation17_spill]]  ;;  %s4263_s19 = sld [smem:[#allocation18_spill]] }
 0x453   : > { %s4264_s20 = sld [smem:[#allocation19_spill]]  ;;  %s4265_s21 = sld [smem:[#allocation20_spill]] }
 0x454   : > { %s4266_s30 = smov %s2905_s10  ;;  %s4267_s10 = smov %s2909_s11 }
 0x455   : > { %s4268_s11 = smov %s3306_s1  ;;  %s4269_s13 = smov %s2921_s14 }
 0x456   : > { %s4270_s14 = smov %s4259_s7  ;;  %s4271_s15 = smov %s2929_s16 }
 0x457   : > { %s4272_s16 = smov %s4260_s6  ;;  %27 = sbr.rel (!%p4096_p1) target bundleno = 23 (0x17), region = 127 }
 0x45e   :  { %2002 = vsyncpa [#allocation3], 1 }
 0x45f   :  { %2004 = vsyncpa [#allocation3 + $0x1], 1 }
 0x460   :  { %2005 = vsyncpa [#allocation6], 1 }
 0x461   :  { %2007 = vsyncpa [#allocation6 + $0x1], 1 }
 0x462   :  { %2008 = vsyncpa [#allocation4], 1 }
 0x463   :  { %2010 = vsyncpa [#allocation4 + $0x1], 1 }

</bundles_post_ra>
